<compile_context>
chip_gen: v6e
topology: v6e:2x2x1
jax: 0.10.0
libtpu: 0.0.40
codegen_flags: <defaults>
</compile_context>

<pallas_src>
import functools

import jax
import jax.numpy as jnp
from jax import lax
from jax.experimental import pallas as pl
from jax.experimental.pallas import tpu as pltpu


# ----------------------------------------------------------------------------
# Fused kernel: one (batch, query-tile) step.
#   QKV proj -> per-head scaled-dot-product attention -> merged output proj.
# ----------------------------------------------------------------------------
def _mha_kernel(q_ref, k_ref, v_ref,
                wq_ref, bq_ref, wk_ref, bk_ref, wv_ref, bv_ref, wo_ref, bo_ref,
                x_ref, attn_ref,
                k_sc, v_sc, ctx_sc,
                *, n_heads, head_dim):
    qi = pl.program_id(1)

    # --- K / V projections: computed once per batch element (query-tile 0),
    #     stored as bf16 in VMEM scratch and reused by every query tile. ------
    @pl.when(qi == 0)
    def _():
        k_sc[...] = (jnp.dot(k_ref[0], wk_ref[...],
                             preferred_element_type=jnp.float32)
                     + bk_ref[...]).astype(jnp.bfloat16)
        v_sc[...] = (jnp.dot(v_ref[0], wv_ref[...],
                             preferred_element_type=jnp.float32)
                     + bv_ref[...]).astype(jnp.bfloat16)

    # --- Q projection for this query tile (1/sqrt(head_dim) already folded
    #     into wq/bq at init, so no per-head scaling below). -------------------
    q_proj = (jnp.dot(q_ref[0], wq_ref[...], preferred_element_type=jnp.float32)
              + bq_ref[...]).astype(jnp.bfloat16)                      # (TQ, H)

    # --- Per-head attention.  Head split/merge = static column slices; every
    #     per-head result is flushed to scratch / the attn output immediately,
    #     so no loop-carried register value stays live across heads.
    #     (With Dh < 128, dynamic lane-offset slicing would force relayouts, so
    #     the loop stays statically unrolled; for nH >= 8 at large S move heads
    #     to a grid axis instead.) ---------------------------------------------
    for h in range(n_heads):
        lo = h * head_dim
        qh = q_proj[:, lo:lo + head_dim]                               # (TQ, Dh) bf16
        kh = k_sc[:, lo:lo + head_dim]                                 # (S,  Dh) bf16
        vh = v_sc[:, lo:lo + head_dim]                                 # (S,  Dh) bf16

        # energy[q, k] = sum_d qh[q, d] * kh[k, d]   (no explicit K transpose)
        energy = lax.dot_general(qh, kh, (((1,), (1,)), ((), ())),
                                 preferred_element_type=jnp.float32)   # (TQ, S)

        # Softmax in fp32; exact division since `attention` is an exported output.
        m = jnp.max(energy, axis=-1, keepdims=True)
        e = jnp.exp(energy - m)
        attn = e / jnp.sum(e, axis=-1, keepdims=True)
        attn_ref[0, h] = attn.astype(attn_ref.dtype)

        # dropout(attention) in eval/inference mode == identity.
        ctx_h = jnp.dot(attn.astype(jnp.bfloat16), vh,
                        preferred_element_type=jnp.float32)            # (TQ, Dh)
        ctx_sc[:, lo:lo + head_dim] = ctx_h.astype(jnp.bfloat16)

    # --- Output projection: ONE K=H matmul on the merged context. -------------
    x_ref[0] = (jnp.dot(ctx_sc[...], wo_ref[...],
                        preferred_element_type=jnp.float32)
                + bo_ref[...]).astype(x_ref.dtype)


# ----------------------------------------------------------------------------
# pallas_call builder
# ----------------------------------------------------------------------------
def _build_mha_call(B, S, H, n_heads, tq, *, single_buffer_weights):
    head_dim = H // n_heads
    kernel = functools.partial(_mha_kernel, n_heads=n_heads, head_dim=head_dim)
    n_q_tiles = S // tq

    if single_buffer_weights:
        # Grid-invariant weights/biases: nothing to prefetch -> single buffer.
        w_spec = pl.BlockSpec((H, H), lambda b, i: (0, 0),
                              pipeline_mode=pl.Buffered(1))
        b_spec = pl.BlockSpec((1, H), lambda b, i: (0, 0),
                              pipeline_mode=pl.Buffered(1))
    else:
        w_spec = pl.BlockSpec((H, H), lambda b, i: (0, 0))
        b_spec = pl.BlockSpec((1, H), lambda b, i: (0, 0))

    q_spec = pl.BlockSpec((1, tq, H), lambda b, i: (b, i, 0))
    kv_spec = pl.BlockSpec((1, S, H), lambda b, i: (b, 0, 0))

    # Rough per-step VMEM budget (bytes) -> explicit scoped limit.
    est = (4 * H * H * 2 + 4 * H * 4                  # weights (bf16) + biases (f32)
           + 2 * (tq * H + 2 * S * H) * 2             # double-buffered q/k/v tiles (bf16)
           + 2 * tq * H * 4                           # double-buffered x out (f32)
           + 2 * n_heads * tq * S * 4                 # double-buffered attn out (f32)
           + 2 * S * H * 2 + tq * H * 2)              # k/v/ctx VMEM scratch (bf16)
    vmem_limit = int(min(max(2 * est, 32 * 1024 * 1024), 64 * 1024 * 1024))

    return pl.pallas_call(
        kernel,
        out_shape=(
            jax.ShapeDtypeStruct((B, S, H), jnp.float32),
            jax.ShapeDtypeStruct((B, n_heads, S, S), jnp.float32),
        ),
        grid_spec=pltpu.PrefetchScalarGridSpec(
            num_scalar_prefetch=0,
            grid=(B, n_q_tiles),
            in_specs=[
                q_spec, kv_spec, kv_spec,
                w_spec, b_spec,     # fc_q (scale pre-folded)
                w_spec, b_spec,     # fc_k
                w_spec, b_spec,     # fc_v
                w_spec, b_spec,     # fc_o
            ],
            out_specs=[
                pl.BlockSpec((1, tq, H), lambda b, i: (b, i, 0)),
                pl.BlockSpec((1, n_heads, tq, S), lambda b, i: (b, 0, i, 0)),
            ],
            scratch_shapes=[
                pltpu.VMEM((S, H), jnp.bfloat16),     # projected K (per batch)
                pltpu.VMEM((S, H), jnp.bfloat16),     # projected V (per batch)
                pltpu.VMEM((tq, H), jnp.bfloat16),    # merged context (per tile)
            ],
        ),
        compiler_params=pltpu.CompilerParams(
            dimension_semantics=("parallel", "arbitrary"),
            vmem_limit_bytes=vmem_limit),
    )


def multi_head_attention(params, query, key, value, mask=None):
    """query/key/value: [B, S, hid_dim] -> (x [B,S,hid], attention [B,nH,S,S]).

    NOTE: `mask` is ignored on purpose — the PyTorch module discards the result
    of the out-of-place masked_fill, so masking has no effect on its output.
    """
    del mask
    B, S, H = query.shape
    nH = params["n_heads"]
    assert H % nH == 0

    tq = S if S <= 128 else 128        # query tile: full S or 128 rows
    assert S % tq == 0, "pad S to a multiple of the query tile upstream"
    # TODO(synk): ragged / non-divisible S needs a pl.cdiv grid + masked stores.

    args = (query.astype(jnp.bfloat16), key.astype(jnp.bfloat16),
            value.astype(jnp.bfloat16),
            params["wq_k"], params["bq_k"],
            params["wk_k"], params["bk_k"],
            params["wv_k"], params["bv_k"],
            params["wo_k"], params["bo_k"])

    try:
        call = _build_mha_call(B, S, H, nH, tq, single_buffer_weights=True)
        return call(*args)
    except Exception:
        # Installed jax may not support pipeline_mode on BlockSpec: fall back to
        # default double-buffered weights (identical numerics).
        call = _build_mha_call(B, S, H, nH, tq, single_buffer_weights=False)
        return call(*args)


def init_params(key, hid_dim, n_heads):
    ks = jax.random.split(key, 8)
    bound = 1.0 / (hid_dim ** 0.5)   # matches nn.Linear default init range

    def lin(kw, kb):
        w = jax.random.uniform(kw, (hid_dim, hid_dim), jnp.float32, -bound, bound)
        b = jax.random.uniform(kb, (hid_dim,), jnp.float32, -bound, bound)
        return w.T, b                 # kernel/reference compute x @ w_t + b

    wq_t, bq = lin(ks[0], ks[1])
    wk_t, bk = lin(ks[2], ks[3])
    wv_t, bv = lin(ks[4], ks[5])
    wo_t, bo = lin(ks[6], ks[7])

    head_dim = hid_dim // n_heads
    inv_scale = 1.0 / (head_dim ** 0.5)

    return dict(
        n_heads=n_heads,
        # fp32 canonical params (pure-JAX reference)
        wq_t=wq_t, bq=bq, wk_t=wk_t, bk=bk, wv_t=wv_t, bv=bv, wo_t=wo_t, bo=bo,
        # kernel-ready params: bf16 MXU operands, 1/sqrt(head_dim) folded into
        # fc_q once at init, biases kept fp32 (added to fp32 MXU accumulators).
        wq_k=(wq_t * inv_scale).astype(jnp.bfloat16),
        bq_k=(bq * inv_scale).reshape(1, hid_dim),
        wk_k=wk_t.astype(jnp.bfloat16), bk_k=bk.reshape(1, hid_dim),
        wv_k=wv_t.astype(jnp.bfloat16), bv_k=bv.reshape(1, hid_dim),
        wo_k=wo_t.astype(jnp.bfloat16), bo_k=bo.reshape(1, hid_dim),
    )


# ----------------------------------------------------------------------------
# Pure-JAX fp32 reference for sanity checking
# ----------------------------------------------------------------------------
def reference(params, query, key, value):
    B, S, H = query.shape
    nH = params["n_heads"]
    Dh = H // nH
    Q = query @ params["wq_t"] + params["bq"]
    K = key @ params["wk_t"] + params["bk"]
    V = value @ params["wv_t"] + params["bv"]
    Qh = Q.reshape(B, S, nH, Dh).transpose(0, 2, 1, 3)
    Kh = K.reshape(B, S, nH, Dh).transpose(0, 2, 1, 3)
    Vh = V.reshape(B, S, nH, Dh).transpose(0, 2, 1, 3)
    energy = jnp.einsum("bhqd,bhkd->bhqk", Qh, Kh) / (Dh ** 0.5)
    attn = jax.nn.softmax(energy, axis=-1)
    ctx = jnp.einsum("bhqk,bhkd->bhqd", attn, Vh)
    x = ctx.transpose(0, 2, 1, 3).reshape(B, S, H)
    x = x @ params["wo_t"] + params["bo"]
    return x, attn


if __name__ == "__main__":
    B, S, HID, NHEADS = 2, 8, 32, 4

    root = jax.random.PRNGKey(0)
    kp, kq, kk, kv = jax.random.split(root, 4)
    params = init_params(kp, HID, NHEADS)

    query = jax.random.normal(kq, (B, S, HID), jnp.float32)
    key = jax.random.normal(kk, (B, S, HID), jnp.float32)
    value = jax.random.normal(kv, (B, S, HID), jnp.float32)

    x, attn = multi_head_attention(params, query, key, value)
    x = jax.block_until_ready(x)
    attn = jax.block_until_ready(attn)

    x_exp, attn_exp = reference(params, query, key, value)
    assert x.shape == (B, S, HID) and attn.shape == (B, NHEADS, S, S)
    # bf16 MXU operands vs. fp32 reference -> ~1e-2-level tolerances.
    assert jnp.allclose(attn, attn_exp, atol=2e-2, rtol=2e-2), \
        float(jnp.max(jnp.abs(attn - attn_exp)))
    assert jnp.allclose(x, x_exp, atol=3e-2, rtol=3e-2), \
        float(jnp.max(jnp.abs(x - x_exp)))

    print("KERNEL_OK")
</pallas_src>

<mosaic_0001>
module attributes {stable_mosaic.version = 11 : i64} {
  func.func @_mha_kernel(%arg0: i32, %arg1: i32, %arg2: memref<1x8x32xbf16, #tpu.memory_space<vmem>>, %arg3: memref<1x8x32xbf16, #tpu.memory_space<vmem>>, %arg4: memref<1x8x32xbf16, #tpu.memory_space<vmem>>, %arg5: memref<32x32xbf16, #tpu.memory_space<vmem>>, %arg6: memref<1x32xf32, #tpu.memory_space<vmem>>, %arg7: memref<32x32xbf16, #tpu.memory_space<vmem>>, %arg8: memref<1x32xf32, #tpu.memory_space<vmem>>, %arg9: memref<32x32xbf16, #tpu.memory_space<vmem>>, %arg10: memref<1x32xf32, #tpu.memory_space<vmem>>, %arg11: memref<32x32xbf16, #tpu.memory_space<vmem>>, %arg12: memref<1x32xf32, #tpu.memory_space<vmem>>, %arg13: memref<1x8x32xf32, #tpu.memory_space<vmem>>, %arg14: memref<1x4x8x8xf32, #tpu.memory_space<vmem>>, %arg15: memref<8x32xbf16, #tpu.memory_space<vmem>>, %arg16: memref<8x32xbf16, #tpu.memory_space<vmem>>, %arg17: memref<8x32xbf16, #tpu.memory_space<vmem>>) attributes {dimension_semantics = [#tpu.dimension_semantics<parallel>, #tpu.dimension_semantics<arbitrary>], iteration_bounds = array<i64: 2, 1>, scalar_prefetch = 0 : i64, scratch_operands = 3 : i64, tpu.core_type = #tpu.core_type<tc>, window_params = [{transform_indices = @transform_0, window_bounds = array<i64: 1, 8, 32>}, {transform_indices = @transform_1, window_bounds = array<i64: 1, 8, 32>}, {transform_indices = @transform_2, window_bounds = array<i64: 1, 8, 32>}, {pipeline_mode = #tpu.pipeline_mode<synchronous>, transform_indices = @transform_3, window_bounds = array<i64: 32, 32>}, {pipeline_mode = #tpu.pipeline_mode<synchronous>, transform_indices = @transform_4, window_bounds = array<i64: 1, 32>}, {pipeline_mode = #tpu.pipeline_mode<synchronous>, transform_indices = @transform_5, window_bounds = array<i64: 32, 32>}, {pipeline_mode = #tpu.pipeline_mode<synchronous>, transform_indices = @transform_6, window_bounds = array<i64: 1, 32>}, {pipeline_mode = #tpu.pipeline_mode<synchronous>, transform_indices = @transform_7, window_bounds = array<i64: 32, 32>}, {pipeline_mode = #tpu.pipeline_mode<synchronous>, transform_indices = @transform_8, window_bounds = array<i64: 1, 32>}, {pipeline_mode = #tpu.pipeline_mode<synchronous>, transform_indices = @transform_9, window_bounds = array<i64: 32, 32>}, {pipeline_mode = #tpu.pipeline_mode<synchronous>, transform_indices = @transform_10, window_bounds = array<i64: 1, 32>}, {transform_indices = @transform_11, window_bounds = array<i64: 1, 8, 32>}, {transform_indices = @transform_12, window_bounds = array<i64: 1, 4, 8, 8>}]} {
    %c0_i32 = arith.constant 0 : i32
    %0 = arith.cmpi eq, %arg1, %c0_i32 : i32
    %1 = arith.extui %0 : i1 to i32
    %c0_i32_0 = arith.constant 0 : i32
    %2 = arith.cmpi ne, %1, %c0_i32_0 : i32
    scf.if %2 {
      %c0_67 = arith.constant 0 : index
      %c0_68 = arith.constant 0 : index
      %c0_69 = arith.constant 0 : index
      %100 = vector.load %arg3[%c0_67, %c0_68, %c0_69] : memref<1x8x32xbf16, #tpu.memory_space<vmem>>, vector<1x8x32xbf16>
      %101 = vector.shape_cast %100 : vector<1x8x32xbf16> to vector<8x32xbf16>
      %c0_70 = arith.constant 0 : index
      %c0_71 = arith.constant 0 : index
      %102 = vector.load %arg7[%c0_70, %c0_71] : memref<32x32xbf16, #tpu.memory_space<vmem>>, vector<32x32xbf16>
      %cst_72 = arith.constant dense<0.000000e+00> : vector<8x32xf32>
      %103 = tpu.matmul %101, %102, %cst_72 {dimension_numbers = #tpu.dot_dimension_numbers<[1], [0], [0], [1], [0, 0, 1, 1], [], []>} : vector<8x32xbf16>, vector<32x32xbf16>, vector<8x32xf32> -> vector<8x32xf32>
      %c0_73 = arith.constant 0 : index
      %c0_74 = arith.constant 0 : index
      %104 = vector.load %arg8[%c0_73, %c0_74] : memref<1x32xf32, #tpu.memory_space<vmem>>, vector<1x32xf32>
      %105 = vector.broadcast %104 : vector<1x32xf32> to vector<8x32xf32>
      %106 = arith.addf %103, %105 : vector<8x32xf32>
      %107 = arith.truncf %106 : vector<8x32xf32> to vector<8x32xbf16>
      %c0_75 = arith.constant 0 : index
      %c0_76 = arith.constant 0 : index
      %108 = vector.load %arg15[%c0_75, %c0_76] : memref<8x32xbf16, #tpu.memory_space<vmem>>, vector<8x32xbf16>
      tpu.vector_store %arg15[%c0_75, %c0_76], %107 {strides = array<i32>} : memref<8x32xbf16, #tpu.memory_space<vmem>>, vector<8x32xbf16>,
      %c0_77 = arith.constant 0 : index
      %c0_78 = arith.constant 0 : index
      %c0_79 = arith.constant 0 : index
      %109 = vector.load %arg4[%c0_77, %c0_78, %c0_79] : memref<1x8x32xbf16, #tpu.memory_space<vmem>>, vector<1x8x32xbf16>
      %110 = vector.shape_cast %109 : vector<1x8x32xbf16> to vector<8x32xbf16>
      %c0_80 = arith.constant 0 : index
      %c0_81 = arith.constant 0 : index
      %111 = vector.load %arg9[%c0_80, %c0_81] : memref<32x32xbf16, #tpu.memory_space<vmem>>, vector<32x32xbf16>
      %cst_82 = arith.constant dense<0.000000e+00> : vector<8x32xf32>
      %112 = tpu.matmul %110, %111, %cst_82 {dimension_numbers = #tpu.dot_dimension_numbers<[1], [0], [0], [1], [0, 0, 1, 1], [], []>} : vector<8x32xbf16>, vector<32x32xbf16>, vector<8x32xf32> -> vector<8x32xf32>
      %c0_83 = arith.constant 0 : index
      %c0_84 = arith.constant 0 : index
      %113 = vector.load %arg10[%c0_83, %c0_84] : memref<1x32xf32, #tpu.memory_space<vmem>>, vector<1x32xf32>
      %114 = vector.broadcast %113 : vector<1x32xf32> to vector<8x32xf32>
      %115 = arith.addf %112, %114 : vector<8x32xf32>
      %116 = arith.truncf %115 : vector<8x32xf32> to vector<8x32xbf16>
      %c0_85 = arith.constant 0 : index
      %c0_86 = arith.constant 0 : index
      %117 = vector.load %arg16[%c0_85, %c0_86] : memref<8x32xbf16, #tpu.memory_space<vmem>>, vector<8x32xbf16>
      tpu.vector_store %arg16[%c0_85, %c0_86], %116 {strides = array<i32>} : memref<8x32xbf16, #tpu.memory_space<vmem>>, vector<8x32xbf16>,
    } else {
    }
    %c0 = arith.constant 0 : index
    %c0_1 = arith.constant 0 : index
    %c0_2 = arith.constant 0 : index
    %3 = vector.load %arg2[%c0, %c0_1, %c0_2] : memref<1x8x32xbf16, #tpu.memory_space<vmem>>, vector<1x8x32xbf16>
    %4 = vector.shape_cast %3 : vector<1x8x32xbf16> to vector<8x32xbf16>
    %c0_3 = arith.constant 0 : index
    %c0_4 = arith.constant 0 : index
    %5 = vector.load %arg5[%c0_3, %c0_4] : memref<32x32xbf16, #tpu.memory_space<vmem>>, vector<32x32xbf16>
    %cst = arith.constant dense<0.000000e+00> : vector<8x32xf32>
    %6 = tpu.matmul %4, %5, %cst {dimension_numbers = #tpu.dot_dimension_numbers<[1], [0], [0], [1], [0, 0, 1, 1], [], []>} : vector<8x32xbf16>, vector<32x32xbf16>, vector<8x32xf32> -> vector<8x32xf32>
    %c0_5 = arith.constant 0 : index
    %c0_6 = arith.constant 0 : index
    %7 = vector.load %arg6[%c0_5, %c0_6] : memref<1x32xf32, #tpu.memory_space<vmem>>, vector<1x32xf32>
    %8 = vector.broadcast %7 : vector<1x32xf32> to vector<8x32xf32>
    %9 = arith.addf %6, %8 : vector<8x32xf32>
    %10 = arith.truncf %9 : vector<8x32xf32> to vector<8x32xbf16>
    %11 = vector.extract_strided_slice %10 {offsets = [0, 0], sizes = [8, 8], strides = [1, 1]} : vector<8x32xbf16> to vector<8x8xbf16>
    %c0_7 = arith.constant 0 : index
    %c0_8 = arith.constant 0 : index
    %12 = vector.load %arg15[%c0_7, %c0_8] : memref<8x32xbf16, #tpu.memory_space<vmem>>, vector<8x8xbf16>
    %c0_9 = arith.constant 0 : index
    %c0_10 = arith.constant 0 : index
    %13 = vector.load %arg16[%c0_9, %c0_10] : memref<8x32xbf16, #tpu.memory_space<vmem>>, vector<8x8xbf16>
    %cst_11 = arith.constant dense<0.000000e+00> : vector<8x8xf32>
    %14 = tpu.matmul %11, %12, %cst_11 {dimension_numbers = #tpu.dot_dimension_numbers<[1], [1], [0], [0], [0, 0, 1, 0], [], []>} : vector<8x8xbf16>, vector<8x8xbf16>, vector<8x8xf32> -> vector<8x8xf32>
    %cst_12 = arith.constant dense<0xFF800000> : vector<8xf32>
    %15 = vector.multi_reduction <maximumf>, %14, %cst_12 [1] : vector<8x8xf32> to vector<8xf32>
    %16 = vector.shape_cast %15 : vector<8xf32> to vector<8x1xf32>
    %17 = vector.broadcast %16 : vector<8x1xf32> to vector<8x8xf32>
    %18 = arith.subf %14, %17 : vector<8x8xf32>
    %19 = math.exp %18 : vector<8x8xf32>
    %cst_13 = arith.constant dense<0.000000e+00> : vector<8xf32>
    %20 = vector.multi_reduction <add>, %19, %cst_13 [1] : vector<8x8xf32> to vector<8xf32>
    %21 = vector.shape_cast %20 : vector<8xf32> to vector<8x1xf32>
    %22 = vector.broadcast %21 : vector<8x1xf32> to vector<8x8xf32>
    %23 = arith.divf %19, %22 : vector<8x8xf32>
    %c0_14 = arith.constant 0 : index
    %c0_15 = arith.constant 0 : index
    %c0_16 = arith.constant 0 : index
    %c0_17 = arith.constant 0 : index
    %24 = vector.load %arg14[%c0_14, %c0_15, %c0_16, %c0_17] : memref<1x4x8x8xf32, #tpu.memory_space<vmem>>, vector<1x1x8x8xf32>
    %25 = vector.shape_cast %24 : vector<1x1x8x8xf32> to vector<8x8xf32>
    %26 = vector.shape_cast %23 : vector<8x8xf32> to vector<1x1x8x8xf32>
    tpu.vector_store %arg14[%c0_14, %c0_15, %c0_16, %c0_17], %26 {strides = array<i32>} : memref<1x4x8x8xf32, #tpu.memory_space<vmem>>, vector<1x1x8x8xf32>,
    %27 = arith.truncf %23 : vector<8x8xf32> to vector<8x8xbf16>
    %cst_18 = arith.constant dense<0.000000e+00> : vector<8x8xf32>
    %28 = tpu.matmul %27, %13, %cst_18 {dimension_numbers = #tpu.dot_dimension_numbers<[1], [0], [0], [1], [0, 0, 1, 1], [], []>} : vector<8x8xbf16>, vector<8x8xbf16>, vector<8x8xf32> -> vector<8x8xf32>
    %29 = arith.truncf %28 : vector<8x8xf32> to vector<8x8xbf16>
    %c0_19 = arith.constant 0 : index
    %c0_20 = arith.constant 0 : index
    %30 = vector.load %arg17[%c0_19, %c0_20] : memref<8x32xbf16, #tpu.memory_space<vmem>>, vector<8x8xbf16>
    tpu.vector_store %arg17[%c0_19, %c0_20], %29 {strides = array<i32>} : memref<8x32xbf16, #tpu.memory_space<vmem>>, vector<8x8xbf16>,
    %31 = vector.extract_strided_slice %10 {offsets = [0, 8], sizes = [8, 8], strides = [1, 1]} : vector<8x32xbf16> to vector<8x8xbf16>
    %c0_21 = arith.constant 0 : index
    %c8 = arith.constant 8 : index
    %32 = vector.load %arg15[%c0_21, %c8] : memref<8x32xbf16, #tpu.memory_space<vmem>>, vector<8x8xbf16>
    %c0_22 = arith.constant 0 : index
    %c8_23 = arith.constant 8 : index
    %33 = vector.load %arg16[%c0_22, %c8_23] : memref<8x32xbf16, #tpu.memory_space<vmem>>, vector<8x8xbf16>
    %cst_24 = arith.constant dense<0.000000e+00> : vector<8x8xf32>
    %34 = tpu.matmul %31, %32, %cst_24 {dimension_numbers = #tpu.dot_dimension_numbers<[1], [1], [0], [0], [0, 0, 1, 0], [], []>} : vector<8x8xbf16>, vector<8x8xbf16>, vector<8x8xf32> -> vector<8x8xf32>
    %cst_25 = arith.constant dense<0xFF800000> : vector<8xf32>
    %35 = vector.multi_reduction <maximumf>, %34, %cst_25 [1] : vector<8x8xf32> to vector<8xf32>
    %36 = vector.shape_cast %35 : vector<8xf32> to vector<8x1xf32>
    %37 = vector.broadcast %36 : vector<8x1xf32> to vector<8x8xf32>
    %38 = arith.subf %34, %37 : vector<8x8xf32>
    %39 = math.exp %38 : vector<8x8xf32>
    %cst_26 = arith.constant dense<0.000000e+00> : vector<8xf32>
    %40 = vector.multi_reduction <add>, %39, %cst_26 [1] : vector<8x8xf32> to vector<8xf32>
    %41 = vector.shape_cast %40 : vector<8xf32> to vector<8x1xf32>
    %42 = vector.broadcast %41 : vector<8x1xf32> to vector<8x8xf32>
    %43 = arith.divf %39, %42 : vector<8x8xf32>
    %c0_27 = arith.constant 0 : index
    %c1 = arith.constant 1 : index
    %c0_28 = arith.constant 0 : index
    %c0_29 = arith.constant 0 : index
    %44 = vector.load %arg14[%c0_27, %c1, %c0_28, %c0_29] : memref<1x4x8x8xf32, #tpu.memory_space<vmem>>, vector<1x1x8x8xf32>
    %45 = vector.shape_cast %44 : vector<1x1x8x8xf32> to vector<8x8xf32>
    %46 = vector.shape_cast %43 : vector<8x8xf32> to vector<1x1x8x8xf32>
    tpu.vector_store %arg14[%c0_27, %c1, %c0_28, %c0_29], %46 {strides = array<i32>} : memref<1x4x8x8xf32, #tpu.memory_space<vmem>>, vector<1x1x8x8xf32>,
    %47 = arith.truncf %43 : vector<8x8xf32> to vector<8x8xbf16>
    %cst_30 = arith.constant dense<0.000000e+00> : vector<8x8xf32>
    %48 = tpu.matmul %47, %33, %cst_30 {dimension_numbers = #tpu.dot_dimension_numbers<[1], [0], [0], [1], [0, 0, 1, 1], [], []>} : vector<8x8xbf16>, vector<8x8xbf16>, vector<8x8xf32> -> vector<8x8xf32>
    %49 = arith.truncf %48 : vector<8x8xf32> to vector<8x8xbf16>
    %c0_31 = arith.constant 0 : index
    %c8_32 = arith.constant 8 : index
    %50 = vector.load %arg17[%c0_31, %c8_32] : memref<8x32xbf16, #tpu.memory_space<vmem>>, vector<8x8xbf16>
    tpu.vector_store %arg17[%c0_31, %c8_32], %49 {strides = array<i32>} : memref<8x32xbf16, #tpu.memory_space<vmem>>, vector<8x8xbf16>,
    %51 = vector.extract_strided_slice %10 {offsets = [0, 16], sizes = [8, 8], strides = [1, 1]} : vector<8x32xbf16> to vector<8x8xbf16>
    %c0_33 = arith.constant 0 : index
    %c16 = arith.constant 16 : index
    %52 = vector.load %arg15[%c0_33, %c16] : memref<8x32xbf16, #tpu.memory_space<vmem>>, vector<8x8xbf16>
    %c0_34 = arith.constant 0 : index
    %c16_35 = arith.constant 16 : index
    %53 = vector.load %arg16[%c0_34, %c16_35] : memref<8x32xbf16, #tpu.memory_space<vmem>>, vector<8x8xbf16>
    %cst_36 = arith.constant dense<0.000000e+00> : vector<8x8xf32>
    %54 = tpu.matmul %51, %52, %cst_36 {dimension_numbers = #tpu.dot_dimension_numbers<[1], [1], [0], [0], [0, 0, 1, 0], [], []>} : vector<8x8xbf16>, vector<8x8xbf16>, vector<8x8xf32> -> vector<8x8xf32>
    %cst_37 = arith.constant dense<0xFF800000> : vector<8xf32>
    %55 = vector.multi_reduction <maximumf>, %54, %cst_37 [1] : vector<8x8xf32> to vector<8xf32>
    %56 = vector.shape_cast %55 : vector<8xf32> to vector<8x1xf32>
    %57 = vector.broadcast %56 : vector<8x1xf32> to vector<8x8xf32>
    %58 = arith.subf %54, %57 : vector<8x8xf32>
    %59 = math.exp %58 : vector<8x8xf32>
    %cst_38 = arith.constant dense<0.000000e+00> : vector<8xf32>
    %60 = vector.multi_reduction <add>, %59, %cst_38 [1] : vector<8x8xf32> to vector<8xf32>
    %61 = vector.shape_cast %60 : vector<8xf32> to vector<8x1xf32>
    %62 = vector.broadcast %61 : vector<8x1xf32> to vector<8x8xf32>
    %63 = arith.divf %59, %62 : vector<8x8xf32>
    %c0_39 = arith.constant 0 : index
    %c2 = arith.constant 2 : index
    %c0_40 = arith.constant 0 : index
    %c0_41 = arith.constant 0 : index
    %64 = vector.load %arg14[%c0_39, %c2, %c0_40, %c0_41] : memref<1x4x8x8xf32, #tpu.memory_space<vmem>>, vector<1x1x8x8xf32>
    %65 = vector.shape_cast %64 : vector<1x1x8x8xf32> to vector<8x8xf32>
    %66 = vector.shape_cast %63 : vector<8x8xf32> to vector<1x1x8x8xf32>
    tpu.vector_store %arg14[%c0_39, %c2, %c0_40, %c0_41], %66 {strides = array<i32>} : memref<1x4x8x8xf32, #tpu.memory_space<vmem>>, vector<1x1x8x8xf32>,
    %67 = arith.truncf %63 : vector<8x8xf32> to vector<8x8xbf16>
    %cst_42 = arith.constant dense<0.000000e+00> : vector<8x8xf32>
    %68 = tpu.matmul %67, %53, %cst_42 {dimension_numbers = #tpu.dot_dimension_numbers<[1], [0], [0], [1], [0, 0, 1, 1], [], []>} : vector<8x8xbf16>, vector<8x8xbf16>, vector<8x8xf32> -> vector<8x8xf32>
    %69 = arith.truncf %68 : vector<8x8xf32> to vector<8x8xbf16>
    %c0_43 = arith.constant 0 : index
    %c16_44 = arith.constant 16 : index
    %70 = vector.load %arg17[%c0_43, %c16_44] : memref<8x32xbf16, #tpu.memory_space<vmem>>, vector<8x8xbf16>
    tpu.vector_store %arg17[%c0_43, %c16_44], %69 {strides = array<i32>} : memref<8x32xbf16, #tpu.memory_space<vmem>>, vector<8x8xbf16>,
    %71 = vector.extract_strided_slice %10 {offsets = [0, 24], sizes = [8, 8], strides = [1, 1]} : vector<8x32xbf16> to vector<8x8xbf16>
    %c0_45 = arith.constant 0 : index
    %c24 = arith.constant 24 : index
    %72 = vector.load %arg15[%c0_45, %c24] : memref<8x32xbf16, #tpu.memory_space<vmem>>, vector<8x8xbf16>
    %c0_46 = arith.constant 0 : index
    %c24_47 = arith.constant 24 : index
    %73 = vector.load %arg16[%c0_46, %c24_47] : memref<8x32xbf16, #tpu.memory_space<vmem>>, vector<8x8xbf16>
    %cst_48 = arith.constant dense<0.000000e+00> : vector<8x8xf32>
    %74 = tpu.matmul %71, %72, %cst_48 {dimension_numbers = #tpu.dot_dimension_numbers<[1], [1], [0], [0], [0, 0, 1, 0], [], []>} : vector<8x8xbf16>, vector<8x8xbf16>, vector<8x8xf32> -> vector<8x8xf32>
    %cst_49 = arith.constant dense<0xFF800000> : vector<8xf32>
    %75 = vector.multi_reduction <maximumf>, %74, %cst_49 [1] : vector<8x8xf32> to vector<8xf32>
    %76 = vector.shape_cast %75 : vector<8xf32> to vector<8x1xf32>
    %77 = vector.broadcast %76 : vector<8x1xf32> to vector<8x8xf32>
    %78 = arith.subf %74, %77 : vector<8x8xf32>
    %79 = math.exp %78 : vector<8x8xf32>
    %cst_50 = arith.constant dense<0.000000e+00> : vector<8xf32>
    %80 = vector.multi_reduction <add>, %79, %cst_50 [1] : vector<8x8xf32> to vector<8xf32>
    %81 = vector.shape_cast %80 : vector<8xf32> to vector<8x1xf32>
    %82 = vector.broadcast %81 : vector<8x1xf32> to vector<8x8xf32>
    %83 = arith.divf %79, %82 : vector<8x8xf32>
    %c0_51 = arith.constant 0 : index
    %c3 = arith.constant 3 : index
    %c0_52 = arith.constant 0 : index
    %c0_53 = arith.constant 0 : index
    %84 = vector.load %arg14[%c0_51, %c3, %c0_52, %c0_53] : memref<1x4x8x8xf32, #tpu.memory_space<vmem>>, vector<1x1x8x8xf32>
    %85 = vector.shape_cast %84 : vector<1x1x8x8xf32> to vector<8x8xf32>
    %86 = vector.shape_cast %83 : vector<8x8xf32> to vector<1x1x8x8xf32>
    tpu.vector_store %arg14[%c0_51, %c3, %c0_52, %c0_53], %86 {strides = array<i32>} : memref<1x4x8x8xf32, #tpu.memory_space<vmem>>, vector<1x1x8x8xf32>,
    %87 = arith.truncf %83 : vector<8x8xf32> to vector<8x8xbf16>
    %cst_54 = arith.constant dense<0.000000e+00> : vector<8x8xf32>
    %88 = tpu.matmul %87, %73, %cst_54 {dimension_numbers = #tpu.dot_dimension_numbers<[1], [0], [0], [1], [0, 0, 1, 1], [], []>} : vector<8x8xbf16>, vector<8x8xbf16>, vector<8x8xf32> -> vector<8x8xf32>
    %89 = arith.truncf %88 : vector<8x8xf32> to vector<8x8xbf16>
    %c0_55 = arith.constant 0 : index
    %c24_56 = arith.constant 24 : index
    %90 = vector.load %arg17[%c0_55, %c24_56] : memref<8x32xbf16, #tpu.memory_space<vmem>>, vector<8x8xbf16>
    tpu.vector_store %arg17[%c0_55, %c24_56], %89 {strides = array<i32>} : memref<8x32xbf16, #tpu.memory_space<vmem>>, vector<8x8xbf16>,
    %c0_57 = arith.constant 0 : index
    %c0_58 = arith.constant 0 : index
    %91 = vector.load %arg17[%c0_57, %c0_58] : memref<8x32xbf16, #tpu.memory_space<vmem>>, vector<8x32xbf16>
    %c0_59 = arith.constant 0 : index
    %c0_60 = arith.constant 0 : index
    %92 = vector.load %arg11[%c0_59, %c0_60] : memref<32x32xbf16, #tpu.memory_space<vmem>>, vector<32x32xbf16>
    %cst_61 = arith.constant dense<0.000000e+00> : vector<8x32xf32>
    %93 = tpu.matmul %91, %92, %cst_61 {dimension_numbers = #tpu.dot_dimension_numbers<[1], [0], [0], [1], [0, 0, 1, 1], [], []>} : vector<8x32xbf16>, vector<32x32xbf16>, vector<8x32xf32> -> vector<8x32xf32>
    %c0_62 = arith.constant 0 : index
    %c0_63 = arith.constant 0 : index
    %94 = vector.load %arg12[%c0_62, %c0_63] : memref<1x32xf32, #tpu.memory_space<vmem>>, vector<1x32xf32>
    %95 = vector.broadcast %94 : vector<1x32xf32> to vector<8x32xf32>
    %96 = arith.addf %93, %95 : vector<8x32xf32>
    %c0_64 = arith.constant 0 : index
    %c0_65 = arith.constant 0 : index
    %c0_66 = arith.constant 0 : index
    %97 = vector.load %arg13[%c0_64, %c0_65, %c0_66] : memref<1x8x32xf32, #tpu.memory_space<vmem>>, vector<1x8x32xf32>
    %98 = vector.shape_cast %97 : vector<1x8x32xf32> to vector<8x32xf32>
    %99 = vector.shape_cast %96 : vector<8x32xf32> to vector<1x8x32xf32>
    tpu.vector_store %arg13[%c0_64, %c0_65, %c0_66], %99 {strides = array<i32>} : memref<1x8x32xf32, #tpu.memory_space<vmem>>, vector<1x8x32xf32>,
    return
  }
  func.func @transform_0(%arg0: i32, %arg1: i32) -> (i32, i32, i32) {
    %c0_i32 = arith.constant 0 : i32
    %c0_i32_0 = arith.constant 0 : i32
    return %arg0, %arg1, %c0_i32 : i32, i32, i32
  }
  func.func @transform_1(%arg0: i32, %arg1: i32) -> (i32, i32, i32) {
    %c0_i32 = arith.constant 0 : i32
    %c0_i32_0 = arith.constant 0 : i32
    %c0_i32_1 = arith.constant 0 : i32
    return %arg0, %c0_i32, %c0_i32_0 : i32, i32, i32
  }
  func.func @transform_2(%arg0: i32, %arg1: i32) -> (i32, i32, i32) {
    %c0_i32 = arith.constant 0 : i32
    %c0_i32_0 = arith.constant 0 : i32
    %c0_i32_1 = arith.constant 0 : i32
    return %arg0, %c0_i32, %c0_i32_0 : i32, i32, i32
  }
  func.func @transform_3(%arg0: i32, %arg1: i32) -> (i32, i32) {
    %c0_i32 = arith.constant 0 : i32
    %c0_i32_0 = arith.constant 0 : i32
    %c0_i32_1 = arith.constant 0 : i32
    return %c0_i32, %c0_i32_0 : i32, i32
  }
  func.func @transform_4(%arg0: i32, %arg1: i32) -> (i32, i32) {
    %c0_i32 = arith.constant 0 : i32
    %c0_i32_0 = arith.constant 0 : i32
    %c0_i32_1 = arith.constant 0 : i32
    return %c0_i32, %c0_i32_0 : i32, i32
  }
  func.func @transform_5(%arg0: i32, %arg1: i32) -> (i32, i32) {
    %c0_i32 = arith.constant 0 : i32
    %c0_i32_0 = arith.constant 0 : i32
    %c0_i32_1 = arith.constant 0 : i32
    return %c0_i32, %c0_i32_0 : i32, i32
  }
  func.func @transform_6(%arg0: i32, %arg1: i32) -> (i32, i32) {
    %c0_i32 = arith.constant 0 : i32
    %c0_i32_0 = arith.constant 0 : i32
    %c0_i32_1 = arith.constant 0 : i32
    return %c0_i32, %c0_i32_0 : i32, i32
  }
  func.func @transform_7(%arg0: i32, %arg1: i32) -> (i32, i32) {
    %c0_i32 = arith.constant 0 : i32
    %c0_i32_0 = arith.constant 0 : i32
    %c0_i32_1 = arith.constant 0 : i32
    return %c0_i32, %c0_i32_0 : i32, i32
  }
  func.func @transform_8(%arg0: i32, %arg1: i32) -> (i32, i32) {
    %c0_i32 = arith.constant 0 : i32
    %c0_i32_0 = arith.constant 0 : i32
    %c0_i32_1 = arith.constant 0 : i32
    return %c0_i32, %c0_i32_0 : i32, i32
  }
  func.func @transform_9(%arg0: i32, %arg1: i32) -> (i32, i32) {
    %c0_i32 = arith.constant 0 : i32
    %c0_i32_0 = arith.constant 0 : i32
    %c0_i32_1 = arith.constant 0 : i32
    return %c0_i32, %c0_i32_0 : i32, i32
  }
  func.func @transform_10(%arg0: i32, %arg1: i32) -> (i32, i32) {
    %c0_i32 = arith.constant 0 : i32
    %c0_i32_0 = arith.constant 0 : i32
    %c0_i32_1 = arith.constant 0 : i32
    return %c0_i32, %c0_i32_0 : i32, i32
  }
  func.func @transform_11(%arg0: i32, %arg1: i32) -> (i32, i32, i32) {
    %c0_i32 = arith.constant 0 : i32
    %c0_i32_0 = arith.constant 0 : i32
    return %arg0, %arg1, %c0_i32 : i32, i32, i32
  }
  func.func @transform_12(%arg0: i32, %arg1: i32) -> (i32, i32, i32, i32) {
    %c0_i32 = arith.constant 0 : i32
    %c0_i32_0 = arith.constant 0 : i32
    %c0_i32_1 = arith.constant 0 : i32
    return %arg0, %c0_i32, %arg1, %c0_i32_0 : i32, i32, i32, i32
  }
}

module attributes {stable_mosaic.version = 11 : i64} {
  func.func @_mha_kernel(%arg0: i32, %arg1: i32, %arg2: memref<1x8x32xbf16, #tpu.memory_space<vmem>>, %arg3: memref<1x8x32xbf16, #tpu.memory_space<vmem>>, %arg4: memref<1x8x32xbf16, #tpu.memory_space<vmem>>, %arg5: memref<32x32xbf16, #tpu.memory_space<vmem>>, %arg6: memref<1x32xf32, #tpu.memory_space<vmem>>, %arg7: memref<32x32xbf16, #tpu.memory_space<vmem>>, %arg8: memref<1x32xf32, #tpu.memory_space<vmem>>, %arg9: memref<32x32xbf16, #tpu.memory_space<vmem>>, %arg10: memref<1x32xf32, #tpu.memory_space<vmem>>, %arg11: memref<32x32xbf16, #tpu.memory_space<vmem>>, %arg12: memref<1x32xf32, #tpu.memory_space<vmem>>, %arg13: memref<1x8x32xf32, #tpu.memory_space<vmem>>, %arg14: memref<1x4x8x8xf32, #tpu.memory_space<vmem>>, %arg15: memref<8x32xbf16, #tpu.memory_space<vmem>>, %arg16: memref<8x32xbf16, #tpu.memory_space<vmem>>, %arg17: memref<8x32xbf16, #tpu.memory_space<vmem>>) attributes {dimension_semantics = [#tpu.dimension_semantics<parallel>, #tpu.dimension_semantics<arbitrary>], iteration_bounds = array<i64: 2, 1>, scalar_prefetch = 0 : i64, scratch_operands = 3 : i64, tpu.core_type = #tpu.core_type<tc>, window_params = [{transform_indices = @transform_0, window_bounds = array<i64: 1, 8, 32>}, {transform_indices = @transform_1, window_bounds = array<i64: 1, 8, 32>}, {transform_indices = @transform_2, window_bounds = array<i64: 1, 8, 32>}, {pipeline_mode = #tpu.pipeline_mode<synchronous>, transform_indices = @transform_3, window_bounds = array<i64: 32, 32>}, {pipeline_mode = #tpu.pipeline_mode<synchronous>, transform_indices = @transform_4, window_bounds = array<i64: 1, 32>}, {pipeline_mode = #tpu.pipeline_mode<synchronous>, transform_indices = @transform_5, window_bounds = array<i64: 32, 32>}, {pipeline_mode = #tpu.pipeline_mode<synchronous>, transform_indices = @transform_6, window_bounds = array<i64: 1, 32>}, {pipeline_mode = #tpu.pipeline_mode<synchronous>, transform_indices = @transform_7, window_bounds = array<i64: 32, 32>}, {pipeline_mode = #tpu.pipeline_mode<synchronous>, transform_indices = @transform_8, window_bounds = array<i64: 1, 32>}, {pipeline_mode = #tpu.pipeline_mode<synchronous>, transform_indices = @transform_9, window_bounds = array<i64: 32, 32>}, {pipeline_mode = #tpu.pipeline_mode<synchronous>, transform_indices = @transform_10, window_bounds = array<i64: 1, 32>}, {transform_indices = @transform_11, window_bounds = array<i64: 1, 8, 32>}, {transform_indices = @transform_12, window_bounds = array<i64: 1, 4, 8, 8>}]} {
    %c0_i32 = arith.constant 0 : i32
    %0 = arith.cmpi eq, %arg1, %c0_i32 : i32
    %1 = arith.extui %0 : i1 to i32
    %c0_i32_0 = arith.constant 0 : i32
    %2 = arith.cmpi ne, %1, %c0_i32_0 : i32
    scf.if %2 {
      %c0_67 = arith.constant 0 : index
      %c0_68 = arith.constant 0 : index
      %c0_69 = arith.constant 0 : index
      %100 = vector.load %arg3[%c0_67, %c0_68, %c0_69] : memref<1x8x32xbf16, #tpu.memory_space<vmem>>, vector<1x8x32xbf16>
      %101 = vector.shape_cast %100 : vector<1x8x32xbf16> to vector<8x32xbf16>
      %c0_70 = arith.constant 0 : index
      %c0_71 = arith.constant 0 : index
      %102 = vector.load %arg7[%c0_70, %c0_71] : memref<32x32xbf16, #tpu.memory_space<vmem>>, vector<32x32xbf16>
      %cst_72 = arith.constant dense<0.000000e+00> : vector<8x32xf32>
      %103 = tpu.matmul %101, %102, %cst_72 {dimension_numbers = #tpu.dot_dimension_numbers<[1], [0], [0], [1], [0, 0, 1, 1], [], []>} : vector<8x32xbf16>, vector<32x32xbf16>, vector<8x32xf32> -> vector<8x32xf32>
      %c0_73 = arith.constant 0 : index
      %c0_74 = arith.constant 0 : index
      %104 = vector.load %arg8[%c0_73, %c0_74] : memref<1x32xf32, #tpu.memory_space<vmem>>, vector<1x32xf32>
      %105 = vector.broadcast %104 : vector<1x32xf32> to vector<8x32xf32>
      %106 = arith.addf %103, %105 : vector<8x32xf32>
      %107 = arith.truncf %106 : vector<8x32xf32> to vector<8x32xbf16>
      %c0_75 = arith.constant 0 : index
      %c0_76 = arith.constant 0 : index
      %108 = vector.load %arg15[%c0_75, %c0_76] : memref<8x32xbf16, #tpu.memory_space<vmem>>, vector<8x32xbf16>
      tpu.vector_store %arg15[%c0_75, %c0_76], %107 {strides = array<i32>} : memref<8x32xbf16, #tpu.memory_space<vmem>>, vector<8x32xbf16>,
      %c0_77 = arith.constant 0 : index
      %c0_78 = arith.constant 0 : index
      %c0_79 = arith.constant 0 : index
      %109 = vector.load %arg4[%c0_77, %c0_78, %c0_79] : memref<1x8x32xbf16, #tpu.memory_space<vmem>>, vector<1x8x32xbf16>
      %110 = vector.shape_cast %109 : vector<1x8x32xbf16> to vector<8x32xbf16>
      %c0_80 = arith.constant 0 : index
      %c0_81 = arith.constant 0 : index
      %111 = vector.load %arg9[%c0_80, %c0_81] : memref<32x32xbf16, #tpu.memory_space<vmem>>, vector<32x32xbf16>
      %cst_82 = arith.constant dense<0.000000e+00> : vector<8x32xf32>
      %112 = tpu.matmul %110, %111, %cst_82 {dimension_numbers = #tpu.dot_dimension_numbers<[1], [0], [0], [1], [0, 0, 1, 1], [], []>} : vector<8x32xbf16>, vector<32x32xbf16>, vector<8x32xf32> -> vector<8x32xf32>
      %c0_83 = arith.constant 0 : index
      %c0_84 = arith.constant 0 : index
      %113 = vector.load %arg10[%c0_83, %c0_84] : memref<1x32xf32, #tpu.memory_space<vmem>>, vector<1x32xf32>
      %114 = vector.broadcast %113 : vector<1x32xf32> to vector<8x32xf32>
      %115 = arith.addf %112, %114 : vector<8x32xf32>
      %116 = arith.truncf %115 : vector<8x32xf32> to vector<8x32xbf16>
      %c0_85 = arith.constant 0 : index
      %c0_86 = arith.constant 0 : index
      %117 = vector.load %arg16[%c0_85, %c0_86] : memref<8x32xbf16, #tpu.memory_space<vmem>>, vector<8x32xbf16>
      tpu.vector_store %arg16[%c0_85, %c0_86], %116 {strides = array<i32>} : memref<8x32xbf16, #tpu.memory_space<vmem>>, vector<8x32xbf16>,
    } else {
    }
    %c0 = arith.constant 0 : index
    %c0_1 = arith.constant 0 : index
    %c0_2 = arith.constant 0 : index
    %3 = vector.load %arg2[%c0, %c0_1, %c0_2] : memref<1x8x32xbf16, #tpu.memory_space<vmem>>, vector<1x8x32xbf16>
    %4 = vector.shape_cast %3 : vector<1x8x32xbf16> to vector<8x32xbf16>
    %c0_3 = arith.constant 0 : index
    %c0_4 = arith.constant 0 : index
    %5 = vector.load %arg5[%c0_3, %c0_4] : memref<32x32xbf16, #tpu.memory_space<vmem>>, vector<32x32xbf16>
    %cst = arith.constant dense<0.000000e+00> : vector<8x32xf32>
    %6 = tpu.matmul %4, %5, %cst {dimension_numbers = #tpu.dot_dimension_numbers<[1], [0], [0], [1], [0, 0, 1, 1], [], []>} : vector<8x32xbf16>, vector<32x32xbf16>, vector<8x32xf32> -> vector<8x32xf32>
    %c0_5 = arith.constant 0 : index
    %c0_6 = arith.constant 0 : index
    %7 = vector.load %arg6[%c0_5, %c0_6] : memref<1x32xf32, #tpu.memory_space<vmem>>, vector<1x32xf32>
    %8 = vector.broadcast %7 : vector<1x32xf32> to vector<8x32xf32>
    %9 = arith.addf %6, %8 : vector<8x32xf32>
    %10 = arith.truncf %9 : vector<8x32xf32> to vector<8x32xbf16>
    %11 = vector.extract_strided_slice %10 {offsets = [0, 0], sizes = [8, 8], strides = [1, 1]} : vector<8x32xbf16> to vector<8x8xbf16>
    %c0_7 = arith.constant 0 : index
    %c0_8 = arith.constant 0 : index
    %12 = vector.load %arg15[%c0_7, %c0_8] : memref<8x32xbf16, #tpu.memory_space<vmem>>, vector<8x8xbf16>
    %c0_9 = arith.constant 0 : index
    %c0_10 = arith.constant 0 : index
    %13 = vector.load %arg16[%c0_9, %c0_10] : memref<8x32xbf16, #tpu.memory_space<vmem>>, vector<8x8xbf16>
    %cst_11 = arith.constant dense<0.000000e+00> : vector<8x8xf32>
    %14 = tpu.matmul %11, %12, %cst_11 {dimension_numbers = #tpu.dot_dimension_numbers<[1], [1], [0], [0], [0, 0, 1, 0], [], []>} : vector<8x8xbf16>, vector<8x8xbf16>, vector<8x8xf32> -> vector<8x8xf32>
    %cst_12 = arith.constant dense<0xFF800000> : vector<8xf32>
    %15 = vector.multi_reduction <maximumf>, %14, %cst_12 [1] : vector<8x8xf32> to vector<8xf32>
    %16 = vector.shape_cast %15 : vector<8xf32> to vector<8x1xf32>
    %17 = vector.broadcast %16 : vector<8x1xf32> to vector<8x8xf32>
    %18 = arith.subf %14, %17 : vector<8x8xf32>
    %19 = math.exp %18 : vector<8x8xf32>
    %cst_13 = arith.constant dense<0.000000e+00> : vector<8xf32>
    %20 = vector.multi_reduction <add>, %19, %cst_13 [1] : vector<8x8xf32> to vector<8xf32>
    %21 = vector.shape_cast %20 : vector<8xf32> to vector<8x1xf32>
    %22 = vector.broadcast %21 : vector<8x1xf32> to vector<8x8xf32>
    %23 = arith.divf %19, %22 : vector<8x8xf32>
    %c0_14 = arith.constant 0 : index
    %c0_15 = arith.constant 0 : index
    %c0_16 = arith.constant 0 : index
    %c0_17 = arith.constant 0 : index
    %24 = vector.load %arg14[%c0_14, %c0_15, %c0_16, %c0_17] : memref<1x4x8x8xf32, #tpu.memory_space<vmem>>, vector<1x1x8x8xf32>
    %25 = vector.shape_cast %24 : vector<1x1x8x8xf32> to vector<8x8xf32>
    %26 = vector.shape_cast %23 : vector<8x8xf32> to vector<1x1x8x8xf32>
    tpu.vector_store %arg14[%c0_14, %c0_15, %c0_16, %c0_17], %26 {strides = array<i32>} : memref<1x4x8x8xf32, #tpu.memory_space<vmem>>, vector<1x1x8x8xf32>,
    %27 = arith.truncf %23 : vector<8x8xf32> to vector<8x8xbf16>
    %cst_18 = arith.constant dense<0.000000e+00> : vector<8x8xf32>
    %28 = tpu.matmul %27, %13, %cst_18 {dimension_numbers = #tpu.dot_dimension_numbers<[1], [0], [0], [1], [0, 0, 1, 1], [], []>} : vector<8x8xbf16>, vector<8x8xbf16>, vector<8x8xf32> -> vector<8x8xf32>
    %29 = arith.truncf %28 : vector<8x8xf32> to vector<8x8xbf16>
    %c0_19 = arith.constant 0 : index
    %c0_20 = arith.constant 0 : index
    %30 = vector.load %arg17[%c0_19, %c0_20] : memref<8x32xbf16, #tpu.memory_space<vmem>>, vector<8x8xbf16>
    tpu.vector_store %arg17[%c0_19, %c0_20], %29 {strides = array<i32>} : memref<8x32xbf16, #tpu.memory_space<vmem>>, vector<8x8xbf16>,
    %31 = vector.extract_strided_slice %10 {offsets = [0, 8], sizes = [8, 8], strides = [1, 1]} : vector<8x32xbf16> to vector<8x8xbf16>
    %c0_21 = arith.constant 0 : index
    %c8 = arith.constant 8 : index
    %32 = vector.load %arg15[%c0_21, %c8] : memref<8x32xbf16, #tpu.memory_space<vmem>>, vector<8x8xbf16>
    %c0_22 = arith.constant 0 : index
    %c8_23 = arith.constant 8 : index
    %33 = vector.load %arg16[%c0_22, %c8_23] : memref<8x32xbf16, #tpu.memory_space<vmem>>, vector<8x8xbf16>
    %cst_24 = arith.constant dense<0.000000e+00> : vector<8x8xf32>
    %34 = tpu.matmul %31, %32, %cst_24 {dimension_numbers = #tpu.dot_dimension_numbers<[1], [1], [0], [0], [0, 0, 1, 0], [], []>} : vector<8x8xbf16>, vector<8x8xbf16>, vector<8x8xf32> -> vector<8x8xf32>
    %cst_25 = arith.constant dense<0xFF800000> : vector<8xf32>
    %35 = vector.multi_reduction <maximumf>, %34, %cst_25 [1] : vector<8x8xf32> to vector<8xf32>
    %36 = vector.shape_cast %35 : vector<8xf32> to vector<8x1xf32>
    %37 = vector.broadcast %36 : vector<8x1xf32> to vector<8x8xf32>
    %38 = arith.subf %34, %37 : vector<8x8xf32>
    %39 = math.exp %38 : vector<8x8xf32>
    %cst_26 = arith.constant dense<0.000000e+00> : vector<8xf32>
    %40 = vector.multi_reduction <add>, %39, %cst_26 [1] : vector<8x8xf32> to vector<8xf32>
    %41 = vector.shape_cast %40 : vector<8xf32> to vector<8x1xf32>
    %42 = vector.broadcast %41 : vector<8x1xf32> to vector<8x8xf32>
    %43 = arith.divf %39, %42 : vector<8x8xf32>
    %c0_27 = arith.constant 0 : index
    %c1 = arith.constant 1 : index
    %c0_28 = arith.constant 0 : index
    %c0_29 = arith.constant 0 : index
    %44 = vector.load %arg14[%c0_27, %c1, %c0_28, %c0_29] : memref<1x4x8x8xf32, #tpu.memory_space<vmem>>, vector<1x1x8x8xf32>
    %45 = vector.shape_cast %44 : vector<1x1x8x8xf32> to vector<8x8xf32>
    %46 = vector.shape_cast %43 : vector<8x8xf32> to vector<1x1x8x8xf32>
    tpu.vector_store %arg14[%c0_27, %c1, %c0_28, %c0_29], %46 {strides = array<i32>} : memref<1x4x8x8xf32, #tpu.memory_space<vmem>>, vector<1x1x8x8xf32>,
    %47 = arith.truncf %43 : vector<8x8xf32> to vector<8x8xbf16>
    %cst_30 = arith.constant dense<0.000000e+00> : vector<8x8xf32>
    %48 = tpu.matmul %47, %33, %cst_30 {dimension_numbers = #tpu.dot_dimension_numbers<[1], [0], [0], [1], [0, 0, 1, 1], [], []>} : vector<8x8xbf16>, vector<8x8xbf16>, vector<8x8xf32> -> vector<8x8xf32>
    %49 = arith.truncf %48 : vector<8x8xf32> to vector<8x8xbf16>
    %c0_31 = arith.constant 0 : index
    %c8_32 = arith.constant 8 : index
    %50 = vector.load %arg17[%c0_31, %c8_32] : memref<8x32xbf16, #tpu.memory_space<vmem>>, vector<8x8xbf16>
    tpu.vector_store %arg17[%c0_31, %c8_32], %49 {strides = array<i32>} : memref<8x32xbf16, #tpu.memory_space<vmem>>, vector<8x8xbf16>,
    %51 = vector.extract_strided_slice %10 {offsets = [0, 16], sizes = [8, 8], strides = [1, 1]} : vector<8x32xbf16> to vector<8x8xbf16>
    %c0_33 = arith.constant 0 : index
    %c16 = arith.constant 16 : index
    %52 = vector.load %arg15[%c0_33, %c16] : memref<8x32xbf16, #tpu.memory_space<vmem>>, vector<8x8xbf16>
    %c0_34 = arith.constant 0 : index
    %c16_35 = arith.constant 16 : index
    %53 = vector.load %arg16[%c0_34, %c16_35] : memref<8x32xbf16, #tpu.memory_space<vmem>>, vector<8x8xbf16>
    %cst_36 = arith.constant dense<0.000000e+00> : vector<8x8xf32>
    %54 = tpu.matmul %51, %52, %cst_36 {dimension_numbers = #tpu.dot_dimension_numbers<[1], [1], [0], [0], [0, 0, 1, 0], [], []>} : vector<8x8xbf16>, vector<8x8xbf16>, vector<8x8xf32> -> vector<8x8xf32>
    %cst_37 = arith.constant dense<0xFF800000> : vector<8xf32>
    %55 = vector.multi_reduction <maximumf>, %54, %cst_37 [1] : vector<8x8xf32> to vector<8xf32>
    %56 = vector.shape_cast %55 : vector<8xf32> to vector<8x1xf32>
    %57 = vector.broadcast %56 : vector<8x1xf32> to vector<8x8xf32>
    %58 = arith.subf %54, %57 : vector<8x8xf32>
    %59 = math.exp %58 : vector<8x8xf32>
    %cst_38 = arith.constant dense<0.000000e+00> : vector<8xf32>
    %60 = vector.multi_reduction <add>, %59, %cst_38 [1] : vector<8x8xf32> to vector<8xf32>
    %61 = vector.shape_cast %60 : vector<8xf32> to vector<8x1xf32>
    %62 = vector.broadcast %61 : vector<8x1xf32> to vector<8x8xf32>
    %63 = arith.divf %59, %62 : vector<8x8xf32>
    %c0_39 = arith.constant 0 : index
    %c2 = arith.constant 2 : index
    %c0_40 = arith.constant 0 : index
    %c0_41 = arith.constant 0 : index
    %64 = vector.load %arg14[%c0_39, %c2, %c0_40, %c0_41] : memref<1x4x8x8xf32, #tpu.memory_space<vmem>>, vector<1x1x8x8xf32>
    %65 = vector.shape_cast %64 : vector<1x1x8x8xf32> to vector<8x8xf32>
    %66 = vector.shape_cast %63 : vector<8x8xf32> to vector<1x1x8x8xf32>
    tpu.vector_store %arg14[%c0_39, %c2, %c0_40, %c0_41], %66 {strides = array<i32>} : memref<1x4x8x8xf32, #tpu.memory_space<vmem>>, vector<1x1x8x8xf32>,
    %67 = arith.truncf %63 : vector<8x8xf32> to vector<8x8xbf16>
    %cst_42 = arith.constant dense<0.000000e+00> : vector<8x8xf32>
    %68 = tpu.matmul %67, %53, %cst_42 {dimension_numbers = #tpu.dot_dimension_numbers<[1], [0], [0], [1], [0, 0, 1, 1], [], []>} : vector<8x8xbf16>, vector<8x8xbf16>, vector<8x8xf32> -> vector<8x8xf32>
    %69 = arith.truncf %68 : vector<8x8xf32> to vector<8x8xbf16>
    %c0_43 = arith.constant 0 : index
    %c16_44 = arith.constant 16 : index
    %70 = vector.load %arg17[%c0_43, %c16_44] : memref<8x32xbf16, #tpu.memory_space<vmem>>, vector<8x8xbf16>
    tpu.vector_store %arg17[%c0_43, %c16_44], %69 {strides = array<i32>} : memref<8x32xbf16, #tpu.memory_space<vmem>>, vector<8x8xbf16>,
    %71 = vector.extract_strided_slice %10 {offsets = [0, 24], sizes = [8, 8], strides = [1, 1]} : vector<8x32xbf16> to vector<8x8xbf16>
    %c0_45 = arith.constant 0 : index
    %c24 = arith.constant 24 : index
    %72 = vector.load %arg15[%c0_45, %c24] : memref<8x32xbf16, #tpu.memory_space<vmem>>, vector<8x8xbf16>
    %c0_46 = arith.constant 0 : index
    %c24_47 = arith.constant 24 : index
    %73 = vector.load %arg16[%c0_46, %c24_47] : memref<8x32xbf16, #tpu.memory_space<vmem>>, vector<8x8xbf16>
    %cst_48 = arith.constant dense<0.000000e+00> : vector<8x8xf32>
    %74 = tpu.matmul %71, %72, %cst_48 {dimension_numbers = #tpu.dot_dimension_numbers<[1], [1], [0], [0], [0, 0, 1, 0], [], []>} : vector<8x8xbf16>, vector<8x8xbf16>, vector<8x8xf32> -> vector<8x8xf32>
    %cst_49 = arith.constant dense<0xFF800000> : vector<8xf32>
    %75 = vector.multi_reduction <maximumf>, %74, %cst_49 [1] : vector<8x8xf32> to vector<8xf32>
    %76 = vector.shape_cast %75 : vector<8xf32> to vector<8x1xf32>
    %77 = vector.broadcast %76 : vector<8x1xf32> to vector<8x8xf32>
    %78 = arith.subf %74, %77 : vector<8x8xf32>
    %79 = math.exp %78 : vector<8x8xf32>
    %cst_50 = arith.constant dense<0.000000e+00> : vector<8xf32>
    %80 = vector.multi_reduction <add>, %79, %cst_50 [1] : vector<8x8xf32> to vector<8xf32>
    %81 = vector.shape_cast %80 : vector<8xf32> to vector<8x1xf32>
    %82 = vector.broadcast %81 : vector<8x1xf32> to vector<8x8xf32>
    %83 = arith.divf %79, %82 : vector<8x8xf32>
    %c0_51 = arith.constant 0 : index
    %c3 = arith.constant 3 : index
    %c0_52 = arith.constant 0 : index
    %c0_53 = arith.constant 0 : index
    %84 = vector.load %arg14[%c0_51, %c3, %c0_52, %c0_53] : memref<1x4x8x8xf32, #tpu.memory_space<vmem>>, vector<1x1x8x8xf32>
    %85 = vector.shape_cast %84 : vector<1x1x8x8xf32> to vector<8x8xf32>
    %86 = vector.shape_cast %83 : vector<8x8xf32> to vector<1x1x8x8xf32>
    tpu.vector_store %arg14[%c0_51, %c3, %c0_52, %c0_53], %86 {strides = array<i32>} : memref<1x4x8x8xf32, #tpu.memory_space<vmem>>, vector<1x1x8x8xf32>,
    %87 = arith.truncf %83 : vector<8x8xf32> to vector<8x8xbf16>
    %cst_54 = arith.constant dense<0.000000e+00> : vector<8x8xf32>
    %88 = tpu.matmul %87, %73, %cst_54 {dimension_numbers = #tpu.dot_dimension_numbers<[1], [0], [0], [1], [0, 0, 1, 1], [], []>} : vector<8x8xbf16>, vector<8x8xbf16>, vector<8x8xf32> -> vector<8x8xf32>
    %89 = arith.truncf %88 : vector<8x8xf32> to vector<8x8xbf16>
    %c0_55 = arith.constant 0 : index
    %c24_56 = arith.constant 24 : index
    %90 = vector.load %arg17[%c0_55, %c24_56] : memref<8x32xbf16, #tpu.memory_space<vmem>>, vector<8x8xbf16>
    tpu.vector_store %arg17[%c0_55, %c24_56], %89 {strides = array<i32>} : memref<8x32xbf16, #tpu.memory_space<vmem>>, vector<8x8xbf16>,
    %c0_57 = arith.constant 0 : index
    %c0_58 = arith.constant 0 : index
    %91 = vector.load %arg17[%c0_57, %c0_58] : memref<8x32xbf16, #tpu.memory_space<vmem>>, vector<8x32xbf16>
    %c0_59 = arith.constant 0 : index
    %c0_60 = arith.constant 0 : index
    %92 = vector.load %arg11[%c0_59, %c0_60] : memref<32x32xbf16, #tpu.memory_space<vmem>>, vector<32x32xbf16>
    %cst_61 = arith.constant dense<0.000000e+00> : vector<8x32xf32>
    %93 = tpu.matmul %91, %92, %cst_61 {dimension_numbers = #tpu.dot_dimension_numbers<[1], [0], [0], [1], [0, 0, 1, 1], [], []>} : vector<8x32xbf16>, vector<32x32xbf16>, vector<8x32xf32> -> vector<8x32xf32>
    %c0_62 = arith.constant 0 : index
    %c0_63 = arith.constant 0 : index
    %94 = vector.load %arg12[%c0_62, %c0_63] : memref<1x32xf32, #tpu.memory_space<vmem>>, vector<1x32xf32>
    %95 = vector.broadcast %94 : vector<1x32xf32> to vector<8x32xf32>
    %96 = arith.addf %93, %95 : vector<8x32xf32>
    %c0_64 = arith.constant 0 : index
    %c0_65 = arith.constant 0 : index
    %c0_66 = arith.constant 0 : index
    %97 = vector.load %arg13[%c0_64, %c0_65, %c0_66] : memref<1x8x32xf32, #tpu.memory_space<vmem>>, vector<1x8x32xf32>
    %98 = vector.shape_cast %97 : vector<1x8x32xf32> to vector<8x32xf32>
    %99 = vector.shape_cast %96 : vector<8x32xf32> to vector<1x8x32xf32>
    tpu.vector_store %arg13[%c0_64, %c0_65, %c0_66], %99 {strides = array<i32>} : memref<1x8x32xf32, #tpu.memory_space<vmem>>, vector<1x8x32xf32>,
    return
  }
  func.func @transform_0(%arg0: i32, %arg1: i32) -> (i32, i32, i32) {
    %c0_i32 = arith.constant 0 : i32
    %c0_i32_0 = arith.constant 0 : i32
    return %arg0, %arg1, %c0_i32 : i32, i32, i32
  }
  func.func @transform_1(%arg0: i32, %arg1: i32) -> (i32, i32, i32) {
    %c0_i32 = arith.constant 0 : i32
    %c0_i32_0 = arith.constant 0 : i32
    %c0_i32_1 = arith.constant 0 : i32
    return %arg0, %c0_i32, %c0_i32_0 : i32, i32, i32
  }
  func.func @transform_2(%arg0: i32, %arg1: i32) -> (i32, i32, i32) {
    %c0_i32 = arith.constant 0 : i32
    %c0_i32_0 = arith.constant 0 : i32
    %c0_i32_1 = arith.constant 0 : i32
    return %arg0, %c0_i32, %c0_i32_0 : i32, i32, i32
  }
  func.func @transform_3(%arg0: i32, %arg1: i32) -> (i32, i32) {
    %c0_i32 = arith.constant 0 : i32
    %c0_i32_0 = arith.constant 0 : i32
    %c0_i32_1 = arith.constant 0 : i32
    return %c0_i32, %c0_i32_0 : i32, i32
  }
  func.func @transform_4(%arg0: i32, %arg1: i32) -> (i32, i32) {
    %c0_i32 = arith.constant 0 : i32
    %c0_i32_0 = arith.constant 0 : i32
    %c0_i32_1 = arith.constant 0 : i32
    return %c0_i32, %c0_i32_0 : i32, i32
  }
  func.func @transform_5(%arg0: i32, %arg1: i32) -> (i32, i32) {
    %c0_i32 = arith.constant 0 : i32
    %c0_i32_0 = arith.constant 0 : i32
    %c0_i32_1 = arith.constant 0 : i32
    return %c0_i32, %c0_i32_0 : i32, i32
  }
  func.func @transform_6(%arg0: i32, %arg1: i32) -> (i32, i32) {
    %c0_i32 = arith.constant 0 : i32
    %c0_i32_0 = arith.constant 0 : i32
    %c0_i32_1 = arith.constant 0 : i32
    return %c0_i32, %c0_i32_0 : i32, i32
  }
  func.func @transform_7(%arg0: i32, %arg1: i32) -> (i32, i32) {
    %c0_i32 = arith.constant 0 : i32
    %c0_i32_0 = arith.constant 0 : i32
    %c0_i32_1 = arith.constant 0 : i32
    return %c0_i32, %c0_i32_0 : i32, i32
  }
  func.func @transform_8(%arg0: i32, %arg1: i32) -> (i32, i32) {
    %c0_i32 = arith.constant 0 : i32
    %c0_i32_0 = arith.constant 0 : i32
    %c0_i32_1 = arith.constant 0 : i32
    return %c0_i32, %c0_i32_0 : i32, i32
  }
  func.func @transform_9(%arg0: i32, %arg1: i32) -> (i32, i32) {
    %c0_i32 = arith.constant 0 : i32
    %c0_i32_0 = arith.constant 0 : i32
    %c0_i32_1 = arith.constant 0 : i32
    return %c0_i32, %c0_i32_0 : i32, i32
  }
  func.func @transform_10(%arg0: i32, %arg1: i32) -> (i32, i32) {
    %c0_i32 = arith.constant 0 : i32
    %c0_i32_0 = arith.constant 0 : i32
    %c0_i32_1 = arith.constant 0 : i32
    return %c0_i32, %c0_i32_0 : i32, i32
  }
  func.func @transform_11(%arg0: i32, %arg1: i32) -> (i32, i32, i32) {
    %c0_i32 = arith.constant 0 : i32
    %c0_i32_0 = arith.constant 0 : i32
    return %arg0, %arg1, %c0_i32 : i32, i32, i32
  }
  func.func @transform_12(%arg0: i32, %arg1: i32) -> (i32, i32, i32, i32) {
    %c0_i32 = arith.constant 0 : i32
    %c0_i32_0 = arith.constant 0 : i32
    %c0_i32_1 = arith.constant 0 : i32
    return %arg0, %c0_i32, %arg1, %c0_i32_0 : i32, i32, i32, i32
  }
}

</mosaic_0001>

<bundles_post_ra>
// kernel: tpu_custom_call.1
= control target key start
LH: loop header
LB: loop body
LE: loop exit
PB: predicated region body
PF: predicated region fallthrough
CT: control target
= control target key end

     0   :  { %s2875_s0 = inlined_call_operand.hbm [shape: bf16[2,8,32], index: 0, kind: input, shape index: {}]   ;;  %s2876_s1 = inlined_call_operand.hbm [shape: bf16[2,8,32], index: 1, kind: input, shape index: {}]   ;;  %s2877_s2 = inlined_call_operand.hbm [shape: bf16[2,8,32], index: 2, kind: input, shape index: {}]   ;;  %s2878_s3 = inlined_call_operand.hbm [shape: bf16[32,32], index: 3, kind: input, shape index: {}]   ;;  %s2879_s4 = inlined_call_operand.hbm [shape: f32[1,32], index: 4, kind: input, shape index: {}]   ;;  %s2880_s5 = inlined_call_operand.hbm [shape: bf16[32,32], index: 5, kind: input, shape index: {}]   ;;  %s2881_s6 = inlined_call_operand.hbm [shape: f32[1,32], index: 6, kind: input, shape index: {}]   ;;  %s2882_s7 = inlined_call_operand.hbm [shape: bf16[32,32], index: 7, kind: input, shape index: {}]   ;;  %s2883_s8 = inlined_call_operand.hbm [shape: f32[1,32], index: 8, kind: input, shape index: {}]   ;;  %s2884_s9 = inlined_call_operand.vmem [shape: bf16[32,32], index: 9, kind: input, shape index: {}]   ;;  %s2885_s10 = inlined_call_operand.vmem [shape: f32[1,32], index: 10, kind: input, shape index: {}]   ;;  %s2886_s11 = inlined_call_operand.hbm [shape: f32[2,8,32], index: 11, kind: output, shape index: {0}]   ;;  %s2887_s12 = inlined_call_operand.hbm [shape: f32[2,4,8,8], index: 12, kind: output, shape index: {1}]  }
   0x1   :  { %2904 = sst [smem:[#allocation36_spill]] %s2878_s3 }
   0x2   :  { %2905 = sst [smem:[#allocation37_spill]] %s2880_s5 }
   0x3   :  { %2906 = sst [smem:[#allocation38_spill]] %s2882_s7 }
   0x4   :  { %2907 = sst [smem:[#allocation39_spill]] %s2885_s10 }
   0x5   :  { %2908 = sst [smem:[#allocation40_spill]] %s2886_s11 }
   0x6   :  { %2909 = sst [smem:[#allocation41_spill]] %s2887_s12 }
   0x7   :  { %18 = vsyncpa [#allocation6], 0 }
   0x8   :  { %20 = vsyncpa [#allocation6 + $0x1], 0 }
   0x9   :  { %21 = vsyncpa [#allocation9], 0 }
   0xa   :  { %23 = vsyncpa [#allocation9 + $0x1], 0 }
   0xb   :  { %24 = vsyncpa [#allocation12], 0 }
   0xc   :  { %25 = vsyncpa [#allocation15], 0 }
   0xd   :  { %26 = vsyncpa [#allocation18], 0 }
   0xe   :  { %27 = vsyncpa [#allocation7], 0 }
   0xf   :  { %29 = vsyncpa [#allocation7 + $0x1], 0 }
  0x10   :  { %30 = vsyncpa [#allocation22], 0 }
  0x11   :  { %32 = vsyncpa [#allocation22 + $0x1], 0  ;;  %s2461_s21 = smov 0   ;;  %s2463_s22 = smov 0  }
  0x12   :  { %s2465_s23 = smov 0   ;;  %s2467_s24 = smov 0  }
  0x13   :  { %s2469_s25 = smov 0   ;;  %s2471_s26 = smov 0  }
  0x14 LB: > { %2910 = sst [smem:[#allocation30_spill]] %s2352_s21  ;;  %s2492_s27 = sadd.s32 4294967295, %s2372_s26   ;;  %s2372_s26 = sphi %s2471_s26, %s38_s26   ;;  %s2368_s25 = sphi %s2469_s25, %s2952_s25   ;;  %s2364_s24 = sphi %s2467_s24, %s2951_s24   ;;  %s2360_s23 = sphi %s2465_s23, %s2955_s23   ;;  %s2356_s22 = sphi %s2463_s22, %s2954_s22   ;;  %s2352_s21 = sphi %s2461_s21, %s2953_s21  }
  0x15   : > { %2911 = sst [smem:[#allocation31_spill]] %s2368_s25  ;;  %p1646_p0 = scmp.ge.s32.totalorder %s2372_s26, 1 }
  0x16   : > { %2912 = sst [smem:[#allocation32_spill]] %s2372_s26  ;;  %p2889_p1 = scmp.eq.s32.totalorder %s2492_s27, 0 }
  0x17   : > { %p359_p2 = scmp.lt.s32.totalorder %s2372_s26, 3  ;;  %s2374_s29 = smov [#allocation11]  }
  0x18   : > { %s371_s30 = sshll.u32 %s2374_s29, 4  ;;  %s2375_s14 = smov [#allocation14]   ;;  %s372_s30 = int_to_ptr.vmem [resolvable:$true] %s371_s30 }
  0x19   : > { %p2497_p3 = pnand %p1646_p0, %p359_p2  ;;  %s395_s15 = sshll.u32 %s2375_s14, 4  ;;  %s396_s15 = int_to_ptr.vmem [resolvable:$true] %s395_s15 }
  0x1a   : > { %s2376_s16 = smov [#allocation17]   ;;  %s2017_s19 = scalar_lea.vmem %s372_s30, 256 }
  0x1b   : > { %s2913_s28 = scalar_select %p2497_p3, 1, 0 }
  0x1c   : > { %p1861_p4 = pneg %p2497_p3  ;;  %s419_s17 = sshll.u32 %s2376_s16, 4  ;;  %s420_s17 = int_to_ptr.vmem [resolvable:$true] %s419_s17 }
  0x1d   : > { %p2018_p8 = scmp.ne.s32.totalorder %s372_s30, %s2017_s19  ;;  %p2025_p11 = scmp.lt.s32.totalorder %s372_s30, %s372_s30 }
  0x1e   : > { %p2506_p6 = pnand %p1861_p4, %p2889_p1  ;;  %p2026_p12 = scmp.lt.s32.totalorder %s2017_s19, %s2017_s19 }
  0x20   : > { %s2914_s13 = scalar_select %p2506_p6, 1, 0 }
  0x21   : > { %p2512_p7 = pneg %p2506_p6  ;;  %p2027_p13 = por %p2026_p12, %p2025_p11 }
  0x23   : > { %p2020_p9 = pnand %p2018_p8, %p2512_p7 }
  0x25   : > { %p2021_p10 = pneg %p2020_p9 }
  0x27   : > { %p2028_p0 = pnand %p2027_p13, %p2021_p10 }
  0x29   : > { %2031 = shalt.err (!%p2028_p0)
}
  0x2a   : > { %s2377_s20 = smov 64   ;;  %s2378_s29 = smov 4  }
  0x2b   : > { %s2916_s3 = sld [smem:[#allocation36_spill]]  ;;  %s2043_s11 = scalar_lea.vmem %s396_s15, 256 }
  0x2c   : > { %p2044_p2 = scmp.ne.s32.totalorder %s396_s15, %s2043_s11  ;;  %p2051_p9 = scmp.lt.s32.totalorder %s396_s15, %s396_s15 }
  0x2d   : > { %p2052_p5 = scmp.lt.s32.totalorder %s2043_s11, %s2043_s11 }
  0x2e   : > { %p2046_p4 = pnand %p2044_p2, %p2512_p7 }
  0x2f   : > { %p2053_p1 = por %p2052_p5, %p2051_p9 }
  0x30   : > { %p2047_p8 = pneg %p2046_p4 }
  0x31   : > { %1864 = dma.hbm_to_vmem [thread:$0]  (!%p2506_p6), %s2916_s3, 256, %s372_s30, [#allocation12], %s2377_s20, %s2377_s20, %s2378_s29  }
  0x32   : > { %p2054_p11 = pnand %p2053_p1, %p2047_p8 }
  0x34   : > { %2057 = shalt.err (!%p2054_p11)
}
  0x35   : > { %s2917_s5 = sld [smem:[#allocation37_spill]]  ;;  %s2069_s14 = scalar_lea.vmem %s420_s17, 256 }
  0x36   : > { %p2070_p10 = scmp.ne.s32.totalorder %s420_s17, %s2069_s14  ;;  %p2077_p0 = scmp.lt.s32.totalorder %s420_s17, %s420_s17 }
  0x37   : > { %p2078_p2 = scmp.lt.s32.totalorder %s2069_s14, %s2069_s14 }
  0x38   : > { %p2072_p12 = pnand %p2070_p10, %p2512_p7 }
  0x39   : > { %p2079_p4 = por %p2078_p2, %p2077_p0 }
  0x3a   : > { %p2073_p13 = pneg %p2072_p12 }
  0x3b   : > { %1870 = dma.hbm_to_vmem [thread:$0]  (!%p2506_p6), %s2917_s5, 256, %s396_s15, [#allocation15], %s2377_s20, %s2377_s20, %s2378_s29  }
  0x3c   : > { %p2080_p3 = pnand %p2079_p4, %p2073_p13 }
  0x3e   : > { %2083 = shalt.err (!%p2080_p3)
}
  0x3f   : > { %s2918_s7 = sld [smem:[#allocation38_spill]]  ;;  %s1645_s10 = sadd.s32 4294967294, %s2372_s26  }
  0x40   : > { %s50_s15 = sadd.s32 1, %s2368_s25  ;;  %s59_s16 = sadd.s32 1, %s2360_s23 }
  0x41   : > { %p52_p1 = scmp.ge.s32.totalorder %s50_s15, 2  ;;  %p66_p3 = scmp.ne.s32.totalorder %s2360_s23, %s2356_s22 }
  0x42   : > { %p67_p5 = scmp.eq.s32.totalorder %s2372_s26, 0  ;;  %p72_p8 = scmp.ne.s32.totalorder %s2356_s22, %s2352_s21 }
  0x43   : > { %s2957_s15 = smov (%p52_p1, %s50_s15), 0  ;;  %p2921_p11 = scmp.eq.s32.totalorder %s2492_s27, 0 }
  0x44   : > { %2919 = sst [smem:[#allocation33_spill]] %s2957_s15  ;;  %p2547_p9 = por %p67_p5, %p66_p3 }
  0x45   : > { %1876 = dma.hbm_to_vmem [thread:$0]  (!%p2506_p6), %s2918_s7, 256, %s420_s17, [#allocation18], %s2377_s20, %s2377_s20, %s2378_s29  }
  0x46   : > { %p2553_p10 = por %p2921_p11, %p72_p8  ;;  %s54_s20 = ssub.s32 %s2368_s25, %s2957_s15 }
  0x47   : > { %p318_p12 = scmp.eq.s32.totalorder %s2492_s27, 1  ;;  %p57_p13 = scmp.eq.s32.totalorder %s54_s20, 0 }
  0x48   : > { %s2922_s17 = scalar_select %p2553_p10, 1, 0 }
  0x49   : > { %p324_p0 = scmp.eq.s32.totalorder %s1645_s10, 1  ;;  %p2560_p2 = por %p318_p12, %p66_p3 }
  0x4a   : > { %p1903_p4 = scmp.lt.s32.totalorder %s2372_s26, 2  ;;  %s2893_s30 = sand.u32 1, %s2360_s23  }
  0x4b   : > { %s2923_s29 = scalar_select %p2560_p2, 1, 0 }
  0x4c   : > { %s2566_s14 = scalar_select %p57_p13, %s2360_s23, %s59_s16  }
  0x4d   : > { %p2568_p1 = por %p324_p0, %p72_p8  ;;  %s2575_s3 = sshll.u32 %s2893_s30, 2 }
  0x4e   : > { %2924 = sst [smem:[#allocation34_spill]] %s2566_s14  ;;  %s2578_s5 = sshll.u32 %s2368_s25, 6 }
  0x4f   : > { %s2925_s11 = scalar_select %p2568_p1, 1, 0 }
  0x50   : > { %p2582_p3 = pnand %p1903_p4, %p2547_p9  ;;  %s469_s16 = sand.u32 1, %s2372_s26  }
  0x51   : > { %2926 = sst [smem:[#allocation35_spill]] %s2925_s11  ;;  %s478_s15 = scalar_lea.hbm %s2876_s1, %s2578_s5 }
  0x52   : > { %s473_s14 = scalar_lea.vmem [#allocation8], %s2575_s3  ;;  %s2379_s30 = smov [#allocation13]  }
  0x53   : > { %s480_s11 = sshll.u32 %s473_s14, 4  ;;  %s385_s21 = sshll.u32 %s2379_s30, 4  ;;  %s481_s11 = int_to_ptr.vmem [resolvable:$true] %s480_s11  ;;  %s386_s21 = int_to_ptr.vmem [resolvable:$true] %s385_s21 }
  0x54   : > { %s2592_s25 = scalar_lea.sflag [#allocation9], %s469_s16  ;;  %p2899_p5 = pneg %p2582_p3 }
  0x55   : > { %s2097_s19 = scalar_lea.vmem %s481_s11, 64  ;;  %s2380_s26 = smov [#allocation8]  }
  0x56   : > { %p2098_p8 = scmp.ne.s32.totalorder %s481_s11, %s2097_s19  ;;  %s2102_s12 = sshll.u32 %s2380_s26, 4  ;;  %s2103_s12 = int_to_ptr.vmem [resolvable:$false] %s2102_s12 }
  0x57   : > { %s2104_s7 = scalar_lea.vmem %s2103_s12, 128  ;;  %p2105_p12 = scmp.lt.s32.totalorder %s481_s11, %s2103_s12 }
  0x58   : > { %p2100_p9 = pnand %p2098_p8, %p2899_p5  ;;  %p2106_p13 = scmp.lt.s32.totalorder %s2104_s7, %s2097_s19 }
  0x5a   : > { %p2101_p11 = pneg %p2100_p9  ;;  %p2107_p0 = por %p2106_p13, %p2105_p12 }
  0x5c   : > { %p2108_p4 = pnand %p2107_p0, %p2101_p11 }
  0x5e   : > { %2111 = shalt.err (!%p2108_p4)
}
  0x5f   : > { %1886 = dma.hbm_to_vmem [thread:$0]  (!%p2582_p3), %s478_s15, 64, %s481_s11, %s2592_s25  }
  0x60   : > { %s2123_s14 = scalar_lea.vmem %s386_s21, 16  ;;  %s2130_s30 = scalar_lea.vmem %s386_s21, 32 }
  0x61   : > { %p2124_p1 = scmp.ne.s32.totalorder %s386_s21, %s2123_s14  ;;  %p2131_p5 = scmp.lt.s32.totalorder %s386_s21, %s386_s21 }
  0x62   : > { %p2132_p2 = scmp.lt.s32.totalorder %s2130_s30, %s2123_s14 }
  0x63   : > { %p2126_p8 = pnand %p2124_p1, %p2512_p7 }
  0x64   : > { %p2133_p10 = por %p2132_p2, %p2131_p5 }
  0x65   : > { %p2127_p9 = pneg %p2126_p8 }
  0x67   : > { %p2134_p6 = pnand %p2133_p10, %p2127_p9 }
  0x69   : > { %2137 = shalt.err (!%p2134_p6)
}
  0x6a   : > { %p2928_p11 = scmp.ne.s32.totalorder %s2914_s13, 0  ;;  %s2381_s15 = smov [#allocation16]  }
  0x6b   : > { %s409_s11 = sshll.u32 %s2381_s15, 4  ;;  %s2382_s16 = smov [#allocation19]   ;;  %s410_s11 = int_to_ptr.vmem [resolvable:$true] %s409_s11 }
  0x6c   : > { %1867 = dma.hbm_to_vmem [thread:$0]  (!%p2928_p11), %s2879_s4, 16, %s386_s21, [#allocation12]  }
  0x6d   : > { %s433_s20 = sshll.u32 %s2382_s16, 4  ;;  %s2149_s19 = scalar_lea.vmem %s410_s11, 16  ;;  %s434_s20 = int_to_ptr.vmem [resolvable:$true] %s433_s20 }
  0x6e   : > { %p2150_p1 = scmp.ne.s32.totalorder %s410_s11, %s2149_s19  ;;  %s2156_s7 = scalar_lea.vmem %s410_s11, 32 }
  0x6f   : > { %p2157_p10 = scmp.lt.s32.totalorder %s410_s11, %s410_s11  ;;  %p2158_p6 = scmp.lt.s32.totalorder %s2156_s7, %s2149_s19 }
  0x70   : > { %p2152_p12 = pnand %p2150_p1, %p2512_p7 }
  0x71   : > { %p2159_p2 = por %p2158_p6, %p2157_p10 }
  0x72   : > { %p2153_p13 = pneg %p2152_p12 }
  0x74   : > { %p2160_p5 = pnand %p2159_p2, %p2153_p13 }
  0x76   : > { %2163 = shalt.err (!%p2160_p5)
}
  0x77   : > { %1873 = dma.hbm_to_vmem [thread:$0]  (!%p2928_p11), %s2881_s6, 16, %s410_s11, [#allocation15]  }
  0x78   : > { %s2175_s30 = scalar_lea.vmem %s434_s20, 16  ;;  %s2182_s12 = scalar_lea.vmem %s434_s20, 32 }
  0x79   : > { %p2176_p0 = scmp.ne.s32.totalorder %s434_s20, %s2175_s30  ;;  %p2183_p9 = scmp.lt.s32.totalorder %s434_s20, %s434_s20 }
  0x7a   : > { %p2184_p1 = scmp.lt.s32.totalorder %s2182_s12, %s2175_s30 }
  0x7b   : > { %p2178_p4 = pnand %p2176_p0, %p2512_p7 }
  0x7c   : > { %p2185_p12 = por %p2184_p1, %p2183_p9 }
  0x7d   : > { %p2179_p8 = pneg %p2178_p4 }
  0x7f   : > { %p2186_p10 = pnand %p2185_p12, %p2179_p8 }
  0x81   : > { %2189 = shalt.err (!%p2186_p10)
}
  0x82   : > { %1879 = dma.hbm_to_vmem [thread:$0]  (!%p2928_p11), %s2883_s8, 16, %s434_s20, [#allocation18]  }
  0x83   : > { %s460_s16 = scalar_lea.hbm %s2875_s0, %s2578_s5  ;;  %s454_s19 = scalar_lea.vmem [#allocation5], %s2575_s3 }
  0x84   : > { %s462_s7 = sshll.u32 %s454_s19, 4  ;;  %s496_s13 = scalar_lea.hbm %s2877_s2, %s2578_s5  ;;  %s463_s7 = int_to_ptr.vmem [resolvable:$true] %s462_s7 }
  0x85   : > { %s2929_s30 = sand.u32 1, %s2360_s23   ;;  %s2203_s26 = scalar_lea.vmem %s463_s7, 64 }
  0x86   : > { %s451_s12 = scalar_lea.sflag [#allocation6], %s2929_s30  ;;  %p2204_p7 = scmp.ne.s32.totalorder %s463_s7, %s2203_s26 }
  0x87   : > { %p2930_p13 = pneg %p2582_p3  ;;  %s2383_s20 = smov [#allocation5]  }
  0x88   : > { %s2208_s15 = sshll.u32 %s2383_s20, 4  ;;  %s2209_s15 = int_to_ptr.vmem [resolvable:$false] %s2208_s15 }
  0x89   : > { %p2206_p6 = pnand %p2204_p7, %p2930_p13  ;;  %s2210_s18 = scalar_lea.vmem %s2209_s15, 128 }
  0x8a   : > { %p2211_p11 = scmp.lt.s32.totalorder %s463_s7, %s2209_s15  ;;  %p2212_p5 = scmp.lt.s32.totalorder %s2210_s18, %s2203_s26 }
  0x8b   : > { %p2207_p2 = pneg %p2206_p6 }
  0x8c   : > { %p2213_p0 = por %p2212_p5, %p2211_p11 }
  0x8e   : > { %p2214_p4 = pnand %p2213_p0, %p2207_p2 }
  0x90   : > { %2217 = shalt.err (!%p2214_p4)
}
  0x91   : > { %1883 = dma.hbm_to_vmem [thread:$0]  (!%p2582_p3), %s460_s16, 64, %s463_s7, %s451_s12  }
  0x92   : > { %s491_s11 = scalar_lea.vmem [#allocation10], %s2575_s3  ;;  %p2931_p9 = pmov %p2930_p13 }
  0x93   : > { %s498_s19 = sshll.u32 %s491_s11, 4  ;;  %s2384_s21 = smov [#allocation10]   ;;  %s499_s19 = int_to_ptr.vmem [resolvable:$true] %s498_s19 }
  0x94   : > { %s2231_s14 = scalar_lea.vmem %s499_s19, 64  ;;  %s2236_s30 = sshll.u32 %s2384_s21, 4  ;;  %s2237_s30 = int_to_ptr.vmem [resolvable:$false] %s2236_s30 }
  0x95   : > { %p2232_p8 = scmp.ne.s32.totalorder %s499_s19, %s2231_s14  ;;  %s2238_s26 = scalar_lea.vmem %s2237_s30, 128 }
  0x96   : > { %p2239_p10 = scmp.lt.s32.totalorder %s499_s19, %s2237_s30  ;;  %p2240_p7 = scmp.lt.s32.totalorder %s2238_s26, %s2231_s14 }
  0x97   : > { %p2234_p1 = pnand %p2232_p8, %p2931_p9 }
  0x98   : > { %p2241_p13 = por %p2240_p7, %p2239_p10 }
  0x99   : > { %p2235_p12 = pneg %p2234_p1 }
  0x9b   : > { %p2242_p6 = pnand %p2241_p13, %p2235_p12 }
  0x9d   : > { %2245 = shalt.err (!%p2242_p6)
}
  0x9e   : > { %1889 = dma.hbm_to_vmem [thread:$0]  (!%p2582_p3), %s496_s13, 64, %s499_s19, %s2592_s25  }
  0x9f   : > { %p2932_p2 = scmp.ne.s32.totalorder %s2913_s28, 0 }
  0xa0   : > { %s2654_s7 = sand.u32 (!%p2932_p2), 1, %s2356_s22   ;;  %p2933_p11 = scmp.ne.s32.totalorder (!%p2932_p2), %s2922_s17, 0 }
  0xa1   : > { %507 = sbr.rel (%p2932_p2) target bundleno = 1569 (0x621), region = 64  ;;  %s2657_s12 = sshll.u32 (!%p2932_p2), %s2654_s7, 2 }
  0xa2   : > { %s510_s10 = scalar_lea.sflag (!%p2932_p2), [#allocation6], %s2654_s7  ;;  %s513_s20 = scalar_lea.vmem (!%p2932_p2), [#allocation5], %s2657_s12 }
  0xa6   : > { %2323 = dma.done.wait (%p2933_p11), %s510_s10, 64  }
  0xa7   : > { %2325 = vsyncadd (%p2933_p11), %s510_s10, 4294967232  ;;  %s518_s5 = sand.u32 1, %s2492_s27   ;;  %s522_s28 = scalar_lea.vmem [#allocation8], %s2657_s12 }
  0xa8   : > { %s519_s25 = scalar_lea.sflag [#allocation9], %s518_s5 }
  0xa9   : > { %2327 = dma.done.wait (%p2933_p11), %s519_s25, 128  }
  0xaa   : > { %2329 = vsyncadd (%p2933_p11), %s519_s25, 4294967168  ;;  %s531_s13 = scalar_lea.vmem [#allocation10], %s2657_s12  ;;  %p2934_p3 = scmp.eq.s32.totalorder %s2492_s27, 0 }
  0xac   : > { %2331 = dma.done.wait (%p2934_p3), [#allocation12], 272   ;;  %p2935_p5 = pmov %p2934_p3 }
  0xad   : > { %p2936_p0 = pmov %p2934_p3 }
  0xae   : > { %2333 = vsyncadd (%p2935_p5), [#allocation12], 4294967024 }
  0xaf   : > { %2335 = dma.done.wait (%p2936_p0), [#allocation15], 272   ;;  %p2937_p4 = pmov %p2936_p0 }
  0xb0   : > { %p2938_p8 = pmov %p2936_p0 }
  0xb1   : > { %2337 = vsyncadd (%p2937_p4), [#allocation15], 4294967024 }
  0xb2   : > { %2339 = dma.done.wait (%p2938_p8), [#allocation18], 272   ;;  %p2939_p9 = pmov %p2936_p0 }
  0xb3   : > { %v2385_v0 = vmov 0.0   ;;  %vm2386_vm0 = vmmov 0   ;;  %v1976_v1 = vld [vmem:[#allocation14 + $0x8] sm:$0xff]   ;;  %v1977_v2 = vld [vmem:[#allocation14] sm:$0xff]   ;;  %vm640_vm1 = vcmask 261120   ;;  %v1978_v4 = vld [vmem:[#allocation11 + $0x8] sm:$0xff]  }
  0xb4   : > { %2341 = vsyncadd (%p2939_p9), [#allocation18], 4294967024  ;;  %1747 = vmatprep.subr.bf16.mxu0 %v2385_v0  ;;  %1751 = vmatprep.mubr.msk.bf16.mxu0 %vm2386_vm0, %v2385_v0  ;;  %v616_v3 = vld [vmem:[%s522_s28] sm:$0xf]  ;;  %v1979_v5 = vld [vmem:[#allocation11] sm:$0xff]   ;;  %vm685_vm2 = vcmask 257024  }
  0xb5   : > { %1755 = vmatprep.subr.bf16.mxu1 %v2385_v0  ;;  %1759 = vmatprep.mubr.msk.bf16.mxu1 %vm2386_vm0, %v2385_v0  ;;  %v756_v6 = vld [vmem:[%s513_s20] sm:$0xf]  ;;  %v687_v9 = vld [vmem:[%s531_s13] sm:$0xf]  ;;  %v1672_v10 = vld [vmem:[#allocation16] ss:$0 sm:$0xff] }
  0xb6   : > { %1748 = vmatpush3.bf16.msra.mxu0 %v1976_v1  ;;  %v1980_v7 = vld [vmem:[#allocation17 + $0x8] sm:$0xff]   ;;  %v1981_v8 = vld [vmem:[#allocation17] sm:$0xff]   ;;  %vm827_vm3 = vcmask 64512   ;;  %s2387_s27 = smov 112   ;;  %s2388_s17 = smov 120   ;;  %vm890_vm4 = vcmask 1043456  }
  0xb7   : > { %1749 = vmatprep.subr.bf16.mxu0 %v2385_v0  ;;  %1756 = vmatpush3.bf16.msra.mxu1 %v1980_v7  ;;  %v1680_v17 = vld [vmem:[#allocation13] ss:$0 sm:$0xff]  ;;  %s2389_s15 = smov 104   ;;  %v1676_v29 = vld [vmem:[#allocation19] ss:$0 sm:$0xff]  ;;  %s1671_s18 = sshll.u32 %s2654_s7, 5 }
  0xb8   : > { %1757 = vmatprep.subr.bf16.mxu1 %v2385_v0  ;;  %s2750_s11 = scalar_lea.vmem [#allocation21], %s1671_s18  ;;  %vm935_vm5 = vcmask 60416   ;;  %s2390_s19 = smov 8   ;;  %vm1065_vm6 = vcmask 126016   ;;  %vm1194_vm7 = vcmask 191616   ;;  %vm1323_vm8 = vcmask 257216  }
  0xb9   : > { %s2391_s3 = smov 16   ;;  %s2392_s16 = smov 24  }
  0xba   : > { %1750 = vmatpush3.bf16.msra.mxu0 %v1977_v2  ;;  %s1718_s12 = sshll.u32 %s2364_s24, 9  ;;  %s1427_s10 = sshll.u32 %s2750_s11, 4  ;;  %s2792_s10 = int_to_ptr.vmem [resolvable:$true] %s1427_s10 }
  0xbb   : > { %1763 = vmatprep.subr.bf16.mxu0 %v2385_v0  ;;  %1758 = vmatpush3.bf16.msra.mxu1 %v1981_v8  ;;  %s2940_s25 = sld [smem:[#allocation41_spill]]  ;;  %p2942_p12 = scmp.ne.s32.totalorder %s2923_s29, 0 }
  0xbc   : > { %1771 = vmatprep.subr.bf16.mxu1 %v2385_v0 }
  0xbd   : > { %1752 = vmatmul.mubr.msk.bf16.vlgmr.msra.gmra.mxu0 %vm640_vm1, %v616_v3 }
  0xbe   : > { %1764 = vmatpush3.bf16.msra.mxu0 %v1978_v4  ;;  %1767 = vmatprep.mubr.msk.bf16.mxu0 %vm2386_vm0, %v2385_v0 }
  0xbf   : > { %1765 = vmatprep.subr.bf16.mxu0 %v2385_v0  ;;  %1760 = vmatmul.mubr.msk.bf16.vlgmr.msra.gmra.mxu1 %vm640_vm1, %v687_v9 }
  0xc0   : > { %1773 = vmatprep.mubr.msk.bf16.mxu1 %vm2386_vm0, %v2385_v0 }
  0xc1   : > { %s2941_s28 = smov %s2940_s25  ;;  %s2790_s13 = scalar_lea.hbm %s2940_s25, %s1718_s12 }
  0xc2   : > { %1766 = vmatpush3.bf16.msra.mxu0 %v1979_v5 }
  0xc3   : > { %1777 = vmatprep.subr.bf16.mxu0 %v2385_v0 }
  0xc5   : > { %1768 = vmatmul.mubr.msk.bf16.vlgmr.msra.gmra.mxu0 %vm640_vm1, %v756_v6 }
  0xc6   : > { %1779 = vmatprep.mubr.msk.bf16.mxu0 %vm2386_vm0, %v2385_v0 }
 0x17d   : > { %v678_v11 = vpop.f32.mrf.mxu0 }
 0x17e   : > { %v679_v12 = vadd.f32 %v1672_v10, %v678_v11 }
 0x17f   : > { %v1753_v13 = vpop.f32.mrf.mxu0  ;;  %v748_v30 = vpop.f32.mrf.mxu1 }
 0x180   : > { %v684_v14 = vpack.c.bf16 %v679_v12, %v679_v12  ;;  %v749_v31 = vadd.f32 %v1676_v29, %v748_v30 }
 0x181   : > { %v681_v15 = vpop.f32.mrf.mxu0  ;;  %v1761_v32 = vpop.f32.mrf.mxu1 }
 0x182   : > { %686 = vst.msk [vmem:[#allocation2] sm:$0xf] %vm685_vm2, %v684_v14  ;;  %v754_v33 = vpack.c.bf16 %v749_v31, %v749_v31 }
 0x183   : > { %v1754_v16 = vpop.f32.mrf.mxu0  ;;  %v751_v34 = vpop.f32.mrf.mxu1 }
 0x184   : > { %755 = vst.msk [vmem:[#allocation3] sm:$0xf] %vm685_vm2, %v754_v33 }
 0x185   : > { %v818_v18 = vpop.f32.mrf.mxu0  ;;  %v1762_v35 = vpop.f32.mrf.mxu1 }
 0x186   : > { %v819_v19 = vadd.f32 %v1680_v17, %v818_v18 }
 0x187   : > { %v1769_v20 = vpop.f32.mrf.mxu0 }
 0x188   : > { %v824_v26 = vpack.c.bf16 %v819_v19, %v819_v19 }
 0x189   : > { %v825_v21 = vld [vmem:[#allocation2] sm:$0xf]  ;;  %v821_v23 = vpop.f32.mrf.mxu0 }
 0x18a   : > { %v1982_v22 = vld [vmem:[#allocation2] ss:$0 sps:$4 sm:$0xff]   ;;  %v832_v24 = vsel %vm827_vm3, %v825_v21, 0 }
 0x18b   : > { %v1983_v25 = vld [vmem:[#allocation2] ss:$0 sps:$4 sm:$0xff]   ;;  %1772 = vmatpush3.bf16.xpose.msra.mxu1 %v832_v24  ;;  %1074 = vrot.lane.b32.xlu1 %v1982_v22, %s2387_s27  ;;  %v1770_v27 = vpop.f32.mrf.mxu0  ;;  %v826_v36 = vld [vmem:[#allocation3] sm:$0xf] }
 0x18c   : > { %945 = vrot.lane.b32.xlu0 %v1983_v25, %s2388_s17  ;;  %1783 = vmatprep.subr.bf16.mxu1 %v2385_v0  ;;  %v1984_v28 = vld [vmem:[#allocation2] ss:$0 sps:$4 sm:$0xff]   ;;  %v892_v37 = vsel %vm890_vm4, %v826_v36, 0  ;;  %v1985_v9 = vld [vmem:[#allocation3] ss:$0 sps:$4 sm:$0xff]  }
 0x18d   : > { %1778 = vmatpush3.bf16.msra.mxu0 %v892_v37  ;;  %v1987_v30 = vld [vmem:[#allocation3] ss:$0 sps:$4 sm:$0xff]  }
 0x18e   : > { %1789 = vmatprep.subr.bf16.mxu0 %v2385_v0 }
 0x18f   : > { %1069 = vrot.lane.b32.xlu1 %v824_v26, %s2387_s27 }
 0x190   : > { %940 = vrot.lane.b32.xlu0 %v824_v26, %s2388_s17 }
 0x192   : > { %1774 = vmatmul.mubr.msk.bf16.vlgmr.msra.gmra.mxu1 %vm827_vm3, %v824_v26 }
 0x193   : > { %1198 = vrot.lane.b32.xlu1 %v824_v26, %s2389_s15  ;;  %1785 = vmatprep.mubr.msk.bf16.mxu1 %vm2386_vm0, %v2385_v0  ;;  %v1986_v26 = vld [vmem:[#allocation3] ss:$0 sps:$4 sm:$0xff]  }
 0x194   : > { %1203 = vrot.lane.b32.xlu0 %v1984_v28, %s2389_s15 }
 0x1fd   : > { %v1075_v40 = vpop.permute.xlu1 %1074 }
 0x1fe   : > { %v946_v38 = vpop.permute.xlu0 %945  ;;  %v1080_v42 = vsel %vm827_vm3, %v1075_v40, 0 }
 0x1ff   : > { %v951_v39 = vsel %vm827_vm3, %v946_v38, 0 }
 0x200   : > { %1784 = vmatpush3.bf16.xpose.msra.mxu1 %v951_v39 }
 0x201   : > { %1795 = vmatprep.subr.bf16.mxu1 %v2385_v0  ;;  %v1070_v44 = vpop.permute.xlu1 %1069 }
 0x202   : > { %v941_v41 = vpop.permute.xlu0 %940 }
 0x205   : > { %v1199_v46 = vpop.permute.xlu1 %1198 }
 0x206   : > { %v1204_v43 = vpop.permute.xlu0 %1203 }
 0x207   : > { %1786 = vmatmul.mubr.msk.bf16.vlgmr.msra.gmra.mxu1 %vm827_vm3, %v941_v41  ;;  %v1209_v45 = vsel %vm827_vm3, %v1204_v43, 0 }
 0x208   : > { %1796 = vmatpush3.bf16.xpose.msra.mxu1 %v1080_v42  ;;  %1797 = vmatprep.mubr.msk.bf16.mxu1 %vm2386_vm0, %v2385_v0 }
 0x209   : > { %1807 = vmatprep.subr.bf16.mxu1 %v2385_v0 }
 0x20f   : > { %1798 = vmatmul.mubr.msk.bf16.vlgmr.msra.gmra.mxu1 %vm827_vm3, %v1070_v44 }
 0x210   : > { %1808 = vmatpush3.bf16.xpose.msra.mxu1 %v1209_v45  ;;  %1809 = vmatprep.mubr.msk.bf16.mxu1 %vm2386_vm0, %v2385_v0 }
 0x211   : > { %1819 = vmatprep.subr.bf16.mxu1 %v2385_v0 }
 0x217   : > { %1810 = vmatmul.mubr.msk.bf16.vlgmr.msra.gmra.mxu1 %vm827_vm3, %v1199_v46 }
 0x218   : > { %1823 = vmatprep.mubr.msk.bf16.mxu1 %vm2386_vm0, %v2385_v0 }
 0x252   : > { %v868_v47 = vpop.f32.mrf.mxu1 }
 0x253   : > { %v874_v48 = vsel %vm827_vm3, %v868_v47, -inf }
 0x254   : > { %875 = vmax.xlane.f32.xlu0 %v874_v48  ;;  %v1775_v49 = vpop.f32.mrf.mxu1 }
 0x256   : > { %v871_v50 = vpop.f32.mrf.mxu1 }
 0x258   : > { %v1776_v51 = vpop.f32.mrf.mxu1 }
 0x2c7   : > { %v987_v52 = vpop.f32.mrf.mxu1 }
 0x2c8   : > { %v993_v53 = vsel %vm827_vm3, %v987_v52, -inf }
 0x2c9   : > { %994 = vmax.xlane.f32.xlu1 %v993_v53  ;;  %v1787_v54 = vpop.f32.mrf.mxu1 }
 0x2cb   : > { %v990_v55 = vpop.f32.mrf.mxu1 }
 0x2cd   : > { %v1788_v56 = vpop.f32.mrf.mxu1 }
 0x2cf   : > { %v1116_v57 = vpop.f32.mrf.mxu1 }
 0x2d0   : > { %v1122_v58 = vsel %vm827_vm3, %v1116_v57, -inf }
 0x2d1   : > { %1123 = vmax.xlane.f32.xlu0 %v1122_v58  ;;  %v1799_v59 = vpop.f32.mrf.mxu1 }
 0x2d2   : > { %v1988_v59 = vld [vmem:[%s2884_s9 + $0x8] sm:$0xff]  }
 0x2d3   : > { %v1119_v60 = vpop.f32.mrf.mxu1  ;;  %1820 = vmatpush3.bf16.msra.mxu1 %v1988_v59 }
 0x2d4   : > { %1821 = vmatprep.subr.bf16.mxu1 %v2385_v0 }
 0x2d5   : > { %v1800_v61 = vpop.f32.mrf.mxu1 }
 0x2d6   : > { %v1989_v61 = vld [vmem:[%s2884_s9] sm:$0xff]  }
 0x2d7   : > { %v1245_v62 = vpop.f32.mrf.mxu1  ;;  %1822 = vmatpush3.bf16.msra.mxu1 %v1989_v61 }
 0x2d8   : > { %v1251_v63 = vsel %vm827_vm3, %v1245_v62, -inf }
 0x2d9   : > { %1252 = vmax.xlane.f32.xlu0 %v1251_v63  ;;  %v1811_v1 = vpop.f32.mrf.mxu1 }
 0x2db   : > { %v1248_v2 = vpop.f32.mrf.mxu1 }
 0x2dd   : > { %v876_v3 = vpop.xlane.xlu0 %875  ;;  %v1812_v4 = vpop.f32.mrf.mxu1 }
 0x2de   : > { %v877_v5 = vsub.f32 %v868_v47, %v876_v3 }
 0x2e0   : > { %v878_v6 = vmul.f32 1.442695, %v877_v5 }
 0x2e2   : > { %1990 = vpow2.f32 %v878_v6 }
 0x2ef   : > { %v1991_v7 = vpop.eup %1990 }
 0x2f0   : > { %v880_v8 = vsel %vm827_vm3, %v1991_v7, 0.0 }
 0x2f1   : > { %881 = vadd.xlane.f32.xlu1 %v880_v8 }
 0x302   : > { %1010 = vrot.lane.b32.xlu1 %v1985_v9, %s2388_s17  ;;  %s2246_s17 = scalar_lea.vmem %s2792_s10, 512 }
 0x303   : > { %p2247_p1 = scmp.ne.s32.totalorder %s2792_s10, %s2246_s17 }
 0x305   : > { %p2248_p10 = pnand %p2247_p1, %p2942_p12 }
 0x307   : > { %p2249_p7 = pneg %p2248_p10 }
 0x352   : > { %v995_v10 = vpop.xlane.xlu1 %994 }
 0x353   : > { %v996_v11 = vsub.f32 %v987_v52, %v995_v10 }
 0x355   : > { %v997_v12 = vmul.f32 1.442695, %v996_v11 }
 0x357   : > { %1992 = vpow2.f32 %v997_v12 }
 0x35a   : > { %v1124_v13 = vpop.xlane.xlu0 %1123 }
 0x35b   : > { %v1125_v14 = vsub.f32 %v1116_v57, %v1124_v13 }
 0x35d   : > { %v1126_v15 = vmul.f32 1.442695, %v1125_v14 }
 0x35f   : > { %1994 = vpow2.f32 %v1126_v15 }
 0x362   : > { %v1253_v16 = vpop.xlane.xlu0 %1252 }
 0x363   : > { %v1254_v17 = vsub.f32 %v1245_v62, %v1253_v16 }
 0x364   : > { %v1993_v18 = vpop.eup %1992 }
 0x365   : > { %v1255_v19 = vmul.f32 1.442695, %v1254_v17  ;;  %v999_v20 = vsel %vm827_vm3, %v1993_v18, 0.0 }
 0x366   : > { %1000 = vadd.xlane.f32.xlu0 %v999_v20 }
 0x367   : > { %1996 = vpow2.f32 %v1255_v19 }
 0x36c   : > { %v1995_v21 = vpop.eup %1994 }
 0x36d   : > { %v1128_v22 = vsel %vm827_vm3, %v1995_v21, 0.0 }
 0x36e   : > { %1129 = vadd.xlane.f32.xlu1 %v1128_v22 }
 0x374   : > { %v1997_v23 = vpop.eup %1996 }
 0x375   : > { %v1257_v24 = vsel %vm827_vm3, %v1997_v23, 0.0 }
 0x376   : > { %1258 = vadd.xlane.f32.xlu0 %v1257_v24 }
 0x37a   : > { %v882_v25 = vpop.xlane.xlu1 %881 }
 0x37b   : > { %1998 = vrcp.f32 %v882_v25 }
 0x37e   : > { %v1011_v29 = vpop.permute.xlu1 %1010 }
 0x37f   : > { %1268 = vrot.lane.b32.xlu1 %v1986_v26, %s2389_s15  ;;  %v1016_v32 = vsel %vm890_vm4, %v1011_v29, 0  ;;  %s2393_s15 = smov [#allocation21]  }
 0x380   : > { %s2250_s18 = sshll.u32 %s2393_s15, 4  ;;  %s2251_s18 = int_to_ptr.vmem [resolvable:$false] %s2250_s18 }
 0x381   : > { %p2253_p13 = scmp.lt.s32.totalorder %s2792_s10, %s2251_s18 }
 0x388   : > { %v1999_v27 = vpop.eup %1998 }
 0x389   : > { %v884_v28 = vmul.f32 %v1999_v27, %v1991_v7 }
 0x38b   : > { %885 = vst.msk [vmem:[%s2750_s11] sm:$0xff] %vm827_vm3, %v884_v28  ;;  %v886_v31 = vpack.c.bf16 %v884_v28, %v884_v28 }
 0x38c   : > { %1139 = vrot.lane.b32.xlu0 %v1987_v30, %s2387_s27  ;;  %s1399_s27 = scalar_lea.sflag [#allocation22], %s2654_s7 }
 0x38d   : > { %1780 = vmatmul.mubr.msk.bf16.vlgmr.msra.gmra.mxu0 %vm827_vm3, %v886_v31 }
 0x38e   : > { %1790 = vmatpush3.bf16.msra.mxu0 %v1016_v32  ;;  %1791 = vmatprep.mubr.msk.bf16.mxu0 %vm2386_vm0, %v2385_v0 }
 0x38f   : > { %1801 = vmatprep.subr.bf16.mxu0 %v2385_v0 }
 0x3ef   : > { %v1001_v33 = vpop.xlane.xlu0 %1000 }
 0x3f0   : > { %2000 = vrcp.f32 %v1001_v33 }
 0x3f7   : > { %v1130_v34 = vpop.xlane.xlu1 %1129 }
 0x3f8   : > { %2002 = vrcp.f32 %v1130_v34 }
 0x3fb   : > { %v1269_v43 = vpop.permute.xlu1 %1268 }
 0x3fc   : > { %v1274_v45 = vsel %vm890_vm4, %v1269_v43, 0 }
 0x3fd   : > { %v2001_v35 = vpop.eup %2000 }
 0x3fe   : > { %v1003_v36 = vmul.f32 %v2001_v35, %v1993_v18 }
 0x3ff   : > { %v1259_v37 = vpop.xlane.xlu0 %1258 }
 0x400   : > { %2004 = vrcp.f32 %v1259_v37  ;;  %1688 = vst.msk [vmem:[%s2750_s11 + $0x8] sm:$0xff] %vm827_vm3, %v1003_v36  ;;  %v1006_v38 = vpack.c.bf16 %v1003_v36, %v1003_v36 }
 0x402   : > { %1792 = vmatmul.mubr.msk.bf16.vlgmr.msra.gmra.mxu0 %vm827_vm3, %v1006_v38 }
 0x403   : > { %v1140_v39 = vpop.permute.xlu0 %1139  ;;  %1803 = vmatprep.mubr.msk.bf16.mxu0 %vm2386_vm0, %v2385_v0 }
 0x404   : > { %v1145_v40 = vsel %vm890_vm4, %v1140_v39, 0 }
 0x405   : > { %v2003_v41 = vpop.eup %2002  ;;  %1802 = vmatpush3.bf16.msra.mxu0 %v1145_v40 }
 0x406   : > { %1813 = vmatprep.subr.bf16.mxu0 %v2385_v0  ;;  %v1132_v42 = vmul.f32 %v2003_v41, %v1995_v21 }
 0x408   : > { %1694 = vst.msk [vmem:[%s2750_s11 + $0x10] sm:$0xff] %vm827_vm3, %v1132_v42  ;;  %v1135_v44 = vpack.c.bf16 %v1132_v42, %v1132_v42 }
 0x40a   : > { %1804 = vmatmul.mubr.msk.bf16.vlgmr.msra.gmra.mxu0 %vm827_vm3, %v1135_v44 }
 0x40b   : > { %1814 = vmatpush3.bf16.msra.mxu0 %v1274_v45  ;;  %1815 = vmatprep.mubr.msk.bf16.mxu0 %vm2386_vm0, %v2385_v0 }
 0x40d   : > { %v2005_v46 = vpop.eup %2004 }
 0x40e   : > { %v1261_v47 = vmul.f32 %v2005_v46, %v1997_v23 }
 0x410   : > { %1700 = vst.msk [vmem:[%s2750_s11 + $0x18] sm:$0xff] %vm827_vm3, %v1261_v47  ;;  %v1264_v48 = vpack.c.bf16 %v1261_v47, %v1261_v47  ;;  %s2252_s11 = scalar_lea.vmem %s2251_s18, 1024 }
 0x411   : > { %p2254_p6 = scmp.lt.s32.totalorder %s2252_s11, %s2246_s17 }
 0x412   : > { %1816 = vmatmul.mubr.msk.bf16.vlgmr.msra.gmra.mxu0 %vm827_vm3, %v1264_v48 }
 0x413   : > { %p2255_p2 = por %p2254_p6, %p2253_p13 }
 0x415   : > { %p2256_p11 = pnand %p2255_p2, %p2249_p7 }
 0x44d   : > { %v928_v49 = vpop.f32.mrf.mxu0 }
 0x44e   : > { %v934_v50 = vpack.c.bf16 %v928_v49, %v928_v49 }
 0x44f   : > { %v1781_v51 = vpop.f32.mrf.mxu0 }
 0x450   : > { %936 = vst.msk [vmem:[#allocation4] sm:$0xf] %vm935_vm5, %v934_v50 }
 0x451   : > { %v931_v52 = vpop.f32.mrf.mxu0 }
 0x453   : > { %v1782_v53 = vpop.f32.mrf.mxu0 }
 0x4c2   : > { %v1052_v54 = vpop.f32.mrf.mxu0 }
 0x4c3   : > { %v1715_v55 = vpack.c.bf16 %v1052_v54, %v1052_v54 }
 0x4c4   : > { %v1793_v56 = vpop.f32.mrf.mxu0 }
 0x4c5   : > { %1062 = vrot.lane.b32.xlu1 %v1715_v55, %s2390_s19 }
 0x4c6   : > { %v1055_v57 = vpop.f32.mrf.mxu0 }
 0x4c8   : > { %v1794_v58 = vpop.f32.mrf.mxu0 }
 0x4ca   : > { %v1181_v60 = vpop.f32.mrf.mxu0 }
 0x4cb   : > { %v1716_v62 = vpack.c.bf16 %v1181_v60, %v1181_v60 }
 0x4cc   : > { %v1805_v63 = vpop.f32.mrf.mxu0 }
 0x4cd   : > { %1191 = vrot.lane.b32.xlu0 %v1716_v62, %s2391_s3 }
 0x4ce   : > { %v1184_v1 = vpop.f32.mrf.mxu0 }
 0x4d0   : > { %v1806_v2 = vpop.f32.mrf.mxu0 }
 0x4d2   : > { %v1310_v3 = vpop.f32.mrf.mxu0 }
 0x4d3   : > { %v1717_v4 = vpack.c.bf16 %v1310_v3, %v1310_v3 }
 0x4d4   : > { %v1817_v5 = vpop.f32.mrf.mxu0 }
 0x4d5   : > { %1320 = vrot.lane.b32.xlu1 %v1717_v4, %s2392_s16 }
 0x4d6   : > { %v1313_v6 = vpop.f32.mrf.mxu0 }
 0x4d8   : > { %v1818_v7 = vpop.f32.mrf.mxu0 }
 0x537   : > { %v1063_v8 = vpop.permute.xlu1 %1062 }
 0x538   : > { %1066 = vst.msk [vmem:[#allocation4] sm:$0xf] %vm1065_vm6, %v1063_v8 }
 0x53f   : > { %v1192_v0 = vpop.permute.xlu0 %1191 }
 0x540   : > { %1195 = vst.msk [vmem:[#allocation4] sm:$0xf] %vm1194_vm7, %v1192_v0 }
 0x547   : > { %v1321_v9 = vpop.permute.xlu1 %1320 }
 0x548   : > { %1324 = vst.msk [vmem:[#allocation4] sm:$0xf] %vm1323_vm8, %v1321_v9 }
 0x54f   : > { %v1325_v10 = vld [vmem:[#allocation4] sm:$0xf] }
 0x550   : > { %1824 = vmatmul.mubr.msk.bf16.vlgmr.msra.gmra.mxu1 %vm640_vm1, %v1325_v10 }
 0x551   : > { %2259 = shalt.err (!%p2256_p11)
}
 0x552   : > { %s2260_s14 = scalar_lea.hbm %s2790_s13, 512  ;;  %s2264_s26 = scalar_lea.hbm %s2941_s28, 1024 }
 0x553   : > { %p2261_p3 = scmp.ne.s32.totalorder %s2790_s13, %s2260_s14  ;;  %p2265_p4 = scmp.lt.s32.totalorder %s2790_s13, %s2941_s28 }
 0x554   : > { %p2266_p8 = scmp.lt.s32.totalorder %s2264_s26, %s2260_s14 }
 0x555   : > { %p2262_p5 = pnand %p2261_p3, %p2942_p12 }
 0x556   : > { %p2267_p9 = por %p2266_p8, %p2265_p4 }
 0x557   : > { %p2263_p0 = pneg %p2262_p5 }
 0x559   : > { %p2268_p1 = pnand %p2267_p9, %p2263_p0 }
 0x55b   : > { %2271 = shalt.err (!%p2268_p1)
}
 0x55c   : > { %s2394_s12 = smov 128   ;;  %s1670_s20 = sshll.u32 %s2654_s7, 3 }
 0x55d   : > { %1858 = dma.vmem_to_hbm [thread:$0]  (%p2942_p12), %s2792_s10, 512, %s2790_s13, %s1399_s27, %s2394_s12, %s2394_s12, %s2390_s19  }
 0x55e   : > { %s2943_s17 = sld [smem:[#allocation39_spill]]  ;;  %s1710_s15 = sshll.u32 %s2364_s24, 7 }
 0x55f   : > { %s603_s18 = scalar_lea.vmem [#allocation20], %s1670_s20  ;;  %s2944_s30 = sld [smem:[#allocation40_spill]] }
 0x560   : > { %s1413_s11 = sshll.u32 %s603_s18, 4  ;;  %s1394_s19 = scalar_lea.sflag [#allocation7], %s2654_s7  ;;  %s2828_s11 = int_to_ptr.vmem [resolvable:$true] %s1413_s11 }
 0x561   : > { %s2272_s24 = scalar_lea.vmem %s2828_s11, 128  ;;  %s2395_s10 = smov [#allocation20]  }
 0x562   : > { %p2273_p10 = scmp.ne.s32.totalorder %s2828_s11, %s2272_s24  ;;  %s2276_s13 = sshll.u32 %s2395_s10, 4  ;;  %s2277_s13 = int_to_ptr.vmem [resolvable:$false] %s2276_s13 }
 0x563   : > { %s2278_s27 = scalar_lea.vmem %s2277_s13, 256  ;;  %p2279_p6 = scmp.lt.s32.totalorder %s2828_s11, %s2277_s13 }
 0x564   : > { %v1704_v11 = vld [vmem:[%s2943_s17] ss:$0 sm:$0xff]  ;;  %p2274_p7 = pnand %p2273_p10, %p2942_p12  ;;  %p2280_p2 = scmp.lt.s32.totalorder %s2278_s27, %s2272_s24 }
 0x565   : > { %s2826_s26 = scalar_lea.hbm %s2944_s30, %s1710_s15 }
 0x566   : > { %p2275_p13 = pneg %p2274_p7  ;;  %p2281_p11 = por %p2280_p2, %p2279_p6 }
 0x568   : > { %p2282_p3 = pnand %p2281_p11, %p2275_p13 }
 0x610   : > { %v1386_v12 = vpop.f32.mrf.mxu1 }
 0x611   : > { %v1387_v13 = vadd.f32 %v1704_v11, %v1386_v12 }
 0x612   : > { %v1825_v14 = vpop.f32.mrf.mxu1 }
 0x613   : > { %1392 = vst.msk [vmem:[%s603_s18] sm:$0xff] %vm640_vm1, %v1387_v13 }
 0x614   : > { %v1389_v15 = vpop.f32.mrf.mxu1 }
 0x615   : > { %2285 = shalt.err (!%p2282_p3)
}
 0x616   : > { %s2286_s3 = scalar_lea.hbm %s2826_s26, 128  ;;  %s2290_s12 = scalar_lea.hbm %s2944_s30, 256 }
 0x617   : > { %p2287_p5 = scmp.ne.s32.totalorder %s2826_s26, %s2286_s3  ;;  %p2291_p8 = scmp.lt.s32.totalorder %s2826_s26, %s2944_s30 }
 0x618   : > { %p2292_p9 = scmp.lt.s32.totalorder %s2290_s12, %s2286_s3 }
 0x619   : > { %p2288_p0 = pnand %p2287_p5, %p2942_p12 }
 0x61a   : > { %p2293_p1 = por %p2292_p9, %p2291_p8 }
 0x61b   : > { %p2289_p4 = pneg %p2288_p0 }
 0x61d   : > { %p2294_p10 = pnand %p2293_p1, %p2289_p4 }
 0x61f   : > { %2297 = shalt.err (!%p2294_p10)
}
 0x620   : > { %1857 = dma.vmem_to_hbm [thread:$0]  (%p2942_p12), %s2828_s11, 128, %s2826_s26, %s1394_s19   ;;  %v1826_v16 = vpop.f32.mrf.mxu1 }
 0x621 PF: > { %s2945_s25 = sld [smem:[#allocation30_spill]] }
 0x622   : > { %s2946_s17 = sld [smem:[#allocation35_spill]] }
 0x623   : > { %s2947_s15 = sld [smem:[#allocation32_spill]] }
 0x627   : > { %s1442_s18 = sand.u32 1, %s2945_s25  }
 0x628   : > { %p2948_p7 = scmp.ne.s32.totalorder %s2946_s17, 0  ;;  %s1443_s14 = scalar_lea.sflag [#allocation7], %s1442_s18 }
 0x629   : > { %p2949_p13 = scmp.ge.s32.totalorder %s2947_s15, 2 }
 0x62b   : > { %p1891_p6 = pnand %p2949_p13, %p2948_p7 }
 0x62d   : > { %p1892_p2 = pneg %p1891_p6 }
 0x62f   : > { %2343 = dma.done.wait (%p1892_p2), %s1443_s14, 128  }
 0x630   : > { %2345 = vsyncadd (%p1892_p2), %s1443_s14, 4294967168  ;;  %s1452_s21 = scalar_lea.sflag [#allocation22], %s1442_s18 }
 0x631   : > { %2347 = dma.done.wait (%p1892_p2), %s1452_s21, 512  }
 0x632   : > { %2349 = vsyncadd (%p1892_p2), %s1452_s21, 4294966784  ;;  %s38_s26 = sadd.s32 1, %s2947_s15   ;;  %s2950_s29 = sld [smem:[#allocation34_spill]] }
 0x633   : > { %p35_p11 = scmp.ge.s32.totalorder %s38_s26, 4   ;;  %s2951_s24 = sld [smem:[#allocation31_spill]] }
 0x634   : > { %s2952_s25 = sld [smem:[#allocation33_spill]]  ;;  %s2953_s21 = smov %s2356_s22 }
 0x635   : > { %s2954_s22 = smov %s2360_s23  ;;  %37 = sbr.rel (!%p35_p11) target bundleno = 20 (0x14), region = 181 }
 0x638   : > { %s2955_s23 = smov %s2950_s29 }
 0x63a   :  { %1457 = vsyncpa [#allocation6], 1 }
 0x63b   :  { %1459 = vsyncpa [#allocation6 + $0x1], 1 }
 0x63c   :  { %1460 = vsyncpa [#allocation9], 1 }
 0x63d   :  { %1462 = vsyncpa [#allocation9 + $0x1], 1 }
 0x63e   :  { %1463 = vsyncpa [#allocation12], 1 }
 0x63f   :  { %1464 = vsyncpa [#allocation15], 1 }
 0x640   :  { %1465 = vsyncpa [#allocation18], 1 }
 0x641   :  { %1466 = vsyncpa [#allocation7], 1 }
 0x642   :  { %1468 = vsyncpa [#allocation7 + $0x1], 1 }
 0x643   :  { %1469 = vsyncpa [#allocation22], 1 }
 0x644   :  { %1471 = vsyncpa [#allocation22 + $0x1], 1 }

// kernel: tpu_custom_call.1
= control target key start
LH: loop header
LB: loop body
LE: loop exit
PB: predicated region body
PF: predicated region fallthrough
CT: control target
= control target key end

     0   :  { %s2875_s0 = inlined_call_operand.hbm [shape: bf16[2,8,32], index: 0, kind: input, shape index: {}]   ;;  %s2876_s1 = inlined_call_operand.hbm [shape: bf16[2,8,32], index: 1, kind: input, shape index: {}]   ;;  %s2877_s2 = inlined_call_operand.hbm [shape: bf16[2,8,32], index: 2, kind: input, shape index: {}]   ;;  %s2878_s3 = inlined_call_operand.hbm [shape: bf16[32,32], index: 3, kind: input, shape index: {}]   ;;  %s2879_s4 = inlined_call_operand.hbm [shape: f32[1,32], index: 4, kind: input, shape index: {}]   ;;  %s2880_s5 = inlined_call_operand.hbm [shape: bf16[32,32], index: 5, kind: input, shape index: {}]   ;;  %s2881_s6 = inlined_call_operand.hbm [shape: f32[1,32], index: 6, kind: input, shape index: {}]   ;;  %s2882_s7 = inlined_call_operand.hbm [shape: bf16[32,32], index: 7, kind: input, shape index: {}]   ;;  %s2883_s8 = inlined_call_operand.hbm [shape: f32[1,32], index: 8, kind: input, shape index: {}]   ;;  %s2884_s9 = inlined_call_operand.vmem [shape: bf16[32,32], index: 9, kind: input, shape index: {}]   ;;  %s2885_s10 = inlined_call_operand.vmem [shape: f32[1,32], index: 10, kind: input, shape index: {}]   ;;  %s2886_s11 = inlined_call_operand.hbm [shape: f32[2,8,32], index: 11, kind: output, shape index: {0}]   ;;  %s2887_s12 = inlined_call_operand.hbm [shape: f32[2,4,8,8], index: 12, kind: output, shape index: {1}]  }
   0x1   :  { %2904 = sst [smem:[#allocation36_spill]] %s2878_s3 }
   0x2   :  { %2905 = sst [smem:[#allocation37_spill]] %s2880_s5 }
   0x3   :  { %2906 = sst [smem:[#allocation38_spill]] %s2882_s7 }
   0x4   :  { %2907 = sst [smem:[#allocation39_spill]] %s2885_s10 }
   0x5   :  { %2908 = sst [smem:[#allocation40_spill]] %s2886_s11 }
   0x6   :  { %2909 = sst [smem:[#allocation41_spill]] %s2887_s12 }
   0x7   :  { %18 = vsyncpa [#allocation6], 0 }
   0x8   :  { %20 = vsyncpa [#allocation6 + $0x1], 0 }
   0x9   :  { %21 = vsyncpa [#allocation9], 0 }
   0xa   :  { %23 = vsyncpa [#allocation9 + $0x1], 0 }
   0xb   :  { %24 = vsyncpa [#allocation12], 0 }
   0xc   :  { %25 = vsyncpa [#allocation15], 0 }
   0xd   :  { %26 = vsyncpa [#allocation18], 0 }
   0xe   :  { %27 = vsyncpa [#allocation7], 0 }
   0xf   :  { %29 = vsyncpa [#allocation7 + $0x1], 0 }
  0x10   :  { %30 = vsyncpa [#allocation22], 0 }
  0x11   :  { %32 = vsyncpa [#allocation22 + $0x1], 0  ;;  %s2461_s21 = smov 0   ;;  %s2463_s22 = smov 0  }
  0x12   :  { %s2465_s23 = smov 0   ;;  %s2467_s24 = smov 0  }
  0x13   :  { %s2469_s25 = smov 0   ;;  %s2471_s26 = smov 0  }
  0x14 LB: > { %2910 = sst [smem:[#allocation30_spill]] %s2352_s21  ;;  %s2492_s27 = sadd.s32 4294967295, %s2372_s26   ;;  %s2372_s26 = sphi %s2471_s26, %s38_s26   ;;  %s2368_s25 = sphi %s2469_s25, %s2952_s25   ;;  %s2364_s24 = sphi %s2467_s24, %s2951_s24   ;;  %s2360_s23 = sphi %s2465_s23, %s2955_s23   ;;  %s2356_s22 = sphi %s2463_s22, %s2954_s22   ;;  %s2352_s21 = sphi %s2461_s21, %s2953_s21  }
  0x15   : > { %2911 = sst [smem:[#allocation31_spill]] %s2368_s25  ;;  %p1646_p0 = scmp.ge.s32.totalorder %s2372_s26, 1 }
  0x16   : > { %2912 = sst [smem:[#allocation32_spill]] %s2372_s26  ;;  %p2889_p1 = scmp.eq.s32.totalorder %s2492_s27, 0 }
  0x17   : > { %p359_p2 = scmp.lt.s32.totalorder %s2372_s26, 3  ;;  %s2374_s29 = smov [#allocation11]  }
  0x18   : > { %s371_s30 = sshll.u32 %s2374_s29, 4  ;;  %s2375_s14 = smov [#allocation14]   ;;  %s372_s30 = int_to_ptr.vmem [resolvable:$true] %s371_s30 }
  0x19   : > { %p2497_p3 = pnand %p1646_p0, %p359_p2  ;;  %s395_s15 = sshll.u32 %s2375_s14, 4  ;;  %s396_s15 = int_to_ptr.vmem [resolvable:$true] %s395_s15 }
  0x1a   : > { %s2376_s16 = smov [#allocation17]   ;;  %s2017_s19 = scalar_lea.vmem %s372_s30, 256 }
  0x1b   : > { %s2913_s28 = scalar_select %p2497_p3, 1, 0 }
  0x1c   : > { %p1861_p4 = pneg %p2497_p3  ;;  %s419_s17 = sshll.u32 %s2376_s16, 4  ;;  %s420_s17 = int_to_ptr.vmem [resolvable:$true] %s419_s17 }
  0x1d   : > { %p2018_p8 = scmp.ne.s32.totalorder %s372_s30, %s2017_s19  ;;  %p2025_p11 = scmp.lt.s32.totalorder %s372_s30, %s372_s30 }
  0x1e   : > { %p2506_p6 = pnand %p1861_p4, %p2889_p1  ;;  %p2026_p12 = scmp.lt.s32.totalorder %s2017_s19, %s2017_s19 }
  0x20   : > { %s2914_s13 = scalar_select %p2506_p6, 1, 0 }
  0x21   : > { %p2512_p7 = pneg %p2506_p6  ;;  %p2027_p13 = por %p2026_p12, %p2025_p11 }
  0x23   : > { %p2020_p9 = pnand %p2018_p8, %p2512_p7 }
  0x25   : > { %p2021_p10 = pneg %p2020_p9 }
  0x27   : > { %p2028_p0 = pnand %p2027_p13, %p2021_p10 }
  0x29   : > { %2031 = shalt.err (!%p2028_p0)
}
  0x2a   : > { %s2377_s20 = smov 64   ;;  %s2378_s29 = smov 4  }
  0x2b   : > { %s2916_s3 = sld [smem:[#allocation36_spill]]  ;;  %s2043_s11 = scalar_lea.vmem %s396_s15, 256 }
  0x2c   : > { %p2044_p2 = scmp.ne.s32.totalorder %s396_s15, %s2043_s11  ;;  %p2051_p9 = scmp.lt.s32.totalorder %s396_s15, %s396_s15 }
  0x2d   : > { %p2052_p5 = scmp.lt.s32.totalorder %s2043_s11, %s2043_s11 }
  0x2e   : > { %p2046_p4 = pnand %p2044_p2, %p2512_p7 }
  0x2f   : > { %p2053_p1 = por %p2052_p5, %p2051_p9 }
  0x30   : > { %p2047_p8 = pneg %p2046_p4 }
  0x31   : > { %1864 = dma.hbm_to_vmem [thread:$0]  (!%p2506_p6), %s2916_s3, 256, %s372_s30, [#allocation12], %s2377_s20, %s2377_s20, %s2378_s29  }
  0x32   : > { %p2054_p11 = pnand %p2053_p1, %p2047_p8 }
  0x34   : > { %2057 = shalt.err (!%p2054_p11)
}
  0x35   : > { %s2917_s5 = sld [smem:[#allocation37_spill]]  ;;  %s2069_s14 = scalar_lea.vmem %s420_s17, 256 }
  0x36   : > { %p2070_p10 = scmp.ne.s32.totalorder %s420_s17, %s2069_s14  ;;  %p2077_p0 = scmp.lt.s32.totalorder %s420_s17, %s420_s17 }
  0x37   : > { %p2078_p2 = scmp.lt.s32.totalorder %s2069_s14, %s2069_s14 }
  0x38   : > { %p2072_p12 = pnand %p2070_p10, %p2512_p7 }
  0x39   : > { %p2079_p4 = por %p2078_p2, %p2077_p0 }
  0x3a   : > { %p2073_p13 = pneg %p2072_p12 }
  0x3b   : > { %1870 = dma.hbm_to_vmem [thread:$0]  (!%p2506_p6), %s2917_s5, 256, %s396_s15, [#allocation15], %s2377_s20, %s2377_s20, %s2378_s29  }
  0x3c   : > { %p2080_p3 = pnand %p2079_p4, %p2073_p13 }
  0x3e   : > { %2083 = shalt.err (!%p2080_p3)
}
  0x3f   : > { %s2918_s7 = sld [smem:[#allocation38_spill]]  ;;  %s1645_s10 = sadd.s32 4294967294, %s2372_s26  }
  0x40   : > { %s50_s15 = sadd.s32 1, %s2368_s25  ;;  %s59_s16 = sadd.s32 1, %s2360_s23 }
  0x41   : > { %p52_p1 = scmp.ge.s32.totalorder %s50_s15, 2  ;;  %p66_p3 = scmp.ne.s32.totalorder %s2360_s23, %s2356_s22 }
  0x42   : > { %p67_p5 = scmp.eq.s32.totalorder %s2372_s26, 0  ;;  %p72_p8 = scmp.ne.s32.totalorder %s2356_s22, %s2352_s21 }
  0x43   : > { %s2957_s15 = smov (%p52_p1, %s50_s15), 0  ;;  %p2921_p11 = scmp.eq.s32.totalorder %s2492_s27, 0 }
  0x44   : > { %2919 = sst [smem:[#allocation33_spill]] %s2957_s15  ;;  %p2547_p9 = por %p67_p5, %p66_p3 }
  0x45   : > { %1876 = dma.hbm_to_vmem [thread:$0]  (!%p2506_p6), %s2918_s7, 256, %s420_s17, [#allocation18], %s2377_s20, %s2377_s20, %s2378_s29  }
  0x46   : > { %p2553_p10 = por %p2921_p11, %p72_p8  ;;  %s54_s20 = ssub.s32 %s2368_s25, %s2957_s15 }
  0x47   : > { %p318_p12 = scmp.eq.s32.totalorder %s2492_s27, 1  ;;  %p57_p13 = scmp.eq.s32.totalorder %s54_s20, 0 }
  0x48   : > { %s2922_s17 = scalar_select %p2553_p10, 1, 0 }
  0x49   : > { %p324_p0 = scmp.eq.s32.totalorder %s1645_s10, 1  ;;  %p2560_p2 = por %p318_p12, %p66_p3 }
  0x4a   : > { %p1903_p4 = scmp.lt.s32.totalorder %s2372_s26, 2  ;;  %s2893_s30 = sand.u32 1, %s2360_s23  }
  0x4b   : > { %s2923_s29 = scalar_select %p2560_p2, 1, 0 }
  0x4c   : > { %s2566_s14 = scalar_select %p57_p13, %s2360_s23, %s59_s16  }
  0x4d   : > { %p2568_p1 = por %p324_p0, %p72_p8  ;;  %s2575_s3 = sshll.u32 %s2893_s30, 2 }
  0x4e   : > { %2924 = sst [smem:[#allocation34_spill]] %s2566_s14  ;;  %s2578_s5 = sshll.u32 %s2368_s25, 6 }
  0x4f   : > { %s2925_s11 = scalar_select %p2568_p1, 1, 0 }
  0x50   : > { %p2582_p3 = pnand %p1903_p4, %p2547_p9  ;;  %s469_s16 = sand.u32 1, %s2372_s26  }
  0x51   : > { %2926 = sst [smem:[#allocation35_spill]] %s2925_s11  ;;  %s478_s15 = scalar_lea.hbm %s2876_s1, %s2578_s5 }
  0x52   : > { %s473_s14 = scalar_lea.vmem [#allocation8], %s2575_s3  ;;  %s2379_s30 = smov [#allocation13]  }
  0x53   : > { %s480_s11 = sshll.u32 %s473_s14, 4  ;;  %s385_s21 = sshll.u32 %s2379_s30, 4  ;;  %s481_s11 = int_to_ptr.vmem [resolvable:$true] %s480_s11  ;;  %s386_s21 = int_to_ptr.vmem [resolvable:$true] %s385_s21 }
  0x54   : > { %s2592_s25 = scalar_lea.sflag [#allocation9], %s469_s16  ;;  %p2899_p5 = pneg %p2582_p3 }
  0x55   : > { %s2097_s19 = scalar_lea.vmem %s481_s11, 64  ;;  %s2380_s26 = smov [#allocation8]  }
  0x56   : > { %p2098_p8 = scmp.ne.s32.totalorder %s481_s11, %s2097_s19  ;;  %s2102_s12 = sshll.u32 %s2380_s26, 4  ;;  %s2103_s12 = int_to_ptr.vmem [resolvable:$false] %s2102_s12 }
  0x57   : > { %s2104_s7 = scalar_lea.vmem %s2103_s12, 128  ;;  %p2105_p12 = scmp.lt.s32.totalorder %s481_s11, %s2103_s12 }
  0x58   : > { %p2100_p9 = pnand %p2098_p8, %p2899_p5  ;;  %p2106_p13 = scmp.lt.s32.totalorder %s2104_s7, %s2097_s19 }
  0x5a   : > { %p2101_p11 = pneg %p2100_p9  ;;  %p2107_p0 = por %p2106_p13, %p2105_p12 }
  0x5c   : > { %p2108_p4 = pnand %p2107_p0, %p2101_p11 }
  0x5e   : > { %2111 = shalt.err (!%p2108_p4)
}
  0x5f   : > { %1886 = dma.hbm_to_vmem [thread:$0]  (!%p2582_p3), %s478_s15, 64, %s481_s11, %s2592_s25  }
  0x60   : > { %s2123_s14 = scalar_lea.vmem %s386_s21, 16  ;;  %s2130_s30 = scalar_lea.vmem %s386_s21, 32 }
  0x61   : > { %p2124_p1 = scmp.ne.s32.totalorder %s386_s21, %s2123_s14  ;;  %p2131_p5 = scmp.lt.s32.totalorder %s386_s21, %s386_s21 }
  0x62   : > { %p2132_p2 = scmp.lt.s32.totalorder %s2130_s30, %s2123_s14 }
  0x63   : > { %p2126_p8 = pnand %p2124_p1, %p2512_p7 }
  0x64   : > { %p2133_p10 = por %p2132_p2, %p2131_p5 }
  0x65   : > { %p2127_p9 = pneg %p2126_p8 }
  0x67   : > { %p2134_p6 = pnand %p2133_p10, %p2127_p9 }
  0x69   : > { %2137 = shalt.err (!%p2134_p6)
}
  0x6a   : > { %p2928_p11 = scmp.ne.s32.totalorder %s2914_s13, 0  ;;  %s2381_s15 = smov [#allocation16]  }
  0x6b   : > { %s409_s11 = sshll.u32 %s2381_s15, 4  ;;  %s2382_s16 = smov [#allocation19]   ;;  %s410_s11 = int_to_ptr.vmem [resolvable:$true] %s409_s11 }
  0x6c   : > { %1867 = dma.hbm_to_vmem [thread:$0]  (!%p2928_p11), %s2879_s4, 16, %s386_s21, [#allocation12]  }
  0x6d   : > { %s433_s20 = sshll.u32 %s2382_s16, 4  ;;  %s2149_s19 = scalar_lea.vmem %s410_s11, 16  ;;  %s434_s20 = int_to_ptr.vmem [resolvable:$true] %s433_s20 }
  0x6e   : > { %p2150_p1 = scmp.ne.s32.totalorder %s410_s11, %s2149_s19  ;;  %s2156_s7 = scalar_lea.vmem %s410_s11, 32 }
  0x6f   : > { %p2157_p10 = scmp.lt.s32.totalorder %s410_s11, %s410_s11  ;;  %p2158_p6 = scmp.lt.s32.totalorder %s2156_s7, %s2149_s19 }
  0x70   : > { %p2152_p12 = pnand %p2150_p1, %p2512_p7 }
  0x71   : > { %p2159_p2 = por %p2158_p6, %p2157_p10 }
  0x72   : > { %p2153_p13 = pneg %p2152_p12 }
  0x74   : > { %p2160_p5 = pnand %p2159_p2, %p2153_p13 }
  0x76   : > { %2163 = shalt.err (!%p2160_p5)
}
  0x77   : > { %1873 = dma.hbm_to_vmem [thread:$0]  (!%p2928_p11), %s2881_s6, 16, %s410_s11, [#allocation15]  }
  0x78   : > { %s2175_s30 = scalar_lea.vmem %s434_s20, 16  ;;  %s2182_s12 = scalar_lea.vmem %s434_s20, 32 }
  0x79   : > { %p2176_p0 = scmp.ne.s32.totalorder %s434_s20, %s2175_s30  ;;  %p2183_p9 = scmp.lt.s32.totalorder %s434_s20, %s434_s20 }
  0x7a   : > { %p2184_p1 = scmp.lt.s32.totalorder %s2182_s12, %s2175_s30 }
  0x7b   : > { %p2178_p4 = pnand %p2176_p0, %p2512_p7 }
  0x7c   : > { %p2185_p12 = por %p2184_p1, %p2183_p9 }
  0x7d   : > { %p2179_p8 = pneg %p2178_p4 }
  0x7f   : > { %p2186_p10 = pnand %p2185_p12, %p2179_p8 }
  0x81   : > { %2189 = shalt.err (!%p2186_p10)
}
  0x82   : > { %1879 = dma.hbm_to_vmem [thread:$0]  (!%p2928_p11), %s2883_s8, 16, %s434_s20, [#allocation18]  }
  0x83   : > { %s460_s16 = scalar_lea.hbm %s2875_s0, %s2578_s5  ;;  %s454_s19 = scalar_lea.vmem [#allocation5], %s2575_s3 }
  0x84   : > { %s462_s7 = sshll.u32 %s454_s19, 4  ;;  %s496_s13 = scalar_lea.hbm %s2877_s2, %s2578_s5  ;;  %s463_s7 = int_to_ptr.vmem [resolvable:$true] %s462_s7 }
  0x85   : > { %s2929_s30 = sand.u32 1, %s2360_s23   ;;  %s2203_s26 = scalar_lea.vmem %s463_s7, 64 }
  0x86   : > { %s451_s12 = scalar_lea.sflag [#allocation6], %s2929_s30  ;;  %p2204_p7 = scmp.ne.s32.totalorder %s463_s7, %s2203_s26 }
  0x87   : > { %p2930_p13 = pneg %p2582_p3  ;;  %s2383_s20 = smov [#allocation5]  }
  0x88   : > { %s2208_s15 = sshll.u32 %s2383_s20, 4  ;;  %s2209_s15 = int_to_ptr.vmem [resolvable:$false] %s2208_s15 }
  0x89   : > { %p2206_p6 = pnand %p2204_p7, %p2930_p13  ;;  %s2210_s18 = scalar_lea.vmem %s2209_s15, 128 }
  0x8a   : > { %p2211_p11 = scmp.lt.s32.totalorder %s463_s7, %s2209_s15  ;;  %p2212_p5 = scmp.lt.s32.totalorder %s2210_s18, %s2203_s26 }
  0x8b   : > { %p2207_p2 = pneg %p2206_p6 }
  0x8c   : > { %p2213_p0 = por %p2212_p5, %p2211_p11 }
  0x8e   : > { %p2214_p4 = pnand %p2213_p0, %p2207_p2 }
  0x90   : > { %2217 = shalt.err (!%p2214_p4)
}
  0x91   : > { %1883 = dma.hbm_to_vmem [thread:$0]  (!%p2582_p3), %s460_s16, 64, %s463_s7, %s451_s12  }
  0x92   : > { %s491_s11 = scalar_lea.vmem [#allocation10], %s2575_s3  ;;  %p2931_p9 = pmov %p2930_p13 }
  0x93   : > { %s498_s19 = sshll.u32 %s491_s11, 4  ;;  %s2384_s21 = smov [#allocation10]   ;;  %s499_s19 = int_to_ptr.vmem [resolvable:$true] %s498_s19 }
  0x94   : > { %s2231_s14 = scalar_lea.vmem %s499_s19, 64  ;;  %s2236_s30 = sshll.u32 %s2384_s21, 4  ;;  %s2237_s30 = int_to_ptr.vmem [resolvable:$false] %s2236_s30 }
  0x95   : > { %p2232_p8 = scmp.ne.s32.totalorder %s499_s19, %s2231_s14  ;;  %s2238_s26 = scalar_lea.vmem %s2237_s30, 128 }
  0x96   : > { %p2239_p10 = scmp.lt.s32.totalorder %s499_s19, %s2237_s30  ;;  %p2240_p7 = scmp.lt.s32.totalorder %s2238_s26, %s2231_s14 }
  0x97   : > { %p2234_p1 = pnand %p2232_p8, %p2931_p9 }
  0x98   : > { %p2241_p13 = por %p2240_p7, %p2239_p10 }
  0x99   : > { %p2235_p12 = pneg %p2234_p1 }
  0x9b   : > { %p2242_p6 = pnand %p2241_p13, %p2235_p12 }
  0x9d   : > { %2245 = shalt.err (!%p2242_p6)
}
  0x9e   : > { %1889 = dma.hbm_to_vmem [thread:$0]  (!%p2582_p3), %s496_s13, 64, %s499_s19, %s2592_s25  }
  0x9f   : > { %p2932_p2 = scmp.ne.s32.totalorder %s2913_s28, 0 }
  0xa0   : > { %s2654_s7 = sand.u32 (!%p2932_p2), 1, %s2356_s22   ;;  %p2933_p11 = scmp.ne.s32.totalorder (!%p2932_p2), %s2922_s17, 0 }
  0xa1   : > { %507 = sbr.rel (%p2932_p2) target bundleno = 1569 (0x621), region = 64  ;;  %s2657_s12 = sshll.u32 (!%p2932_p2), %s2654_s7, 2 }
  0xa2   : > { %s510_s10 = scalar_lea.sflag (!%p2932_p2), [#allocation6], %s2654_s7  ;;  %s513_s20 = scalar_lea.vmem (!%p2932_p2), [#allocation5], %s2657_s12 }
  0xa6   : > { %2323 = dma.done.wait (%p2933_p11), %s510_s10, 64  }
  0xa7   : > { %2325 = vsyncadd (%p2933_p11), %s510_s10, 4294967232  ;;  %s518_s5 = sand.u32 1, %s2492_s27   ;;  %s522_s28 = scalar_lea.vmem [#allocation8], %s2657_s12 }
  0xa8   : > { %s519_s25 = scalar_lea.sflag [#allocation9], %s518_s5 }
  0xa9   : > { %2327 = dma.done.wait (%p2933_p11), %s519_s25, 128  }
  0xaa   : > { %2329 = vsyncadd (%p2933_p11), %s519_s25, 4294967168  ;;  %s531_s13 = scalar_lea.vmem [#allocation10], %s2657_s12  ;;  %p2934_p3 = scmp.eq.s32.totalorder %s2492_s27, 0 }
  0xac   : > { %2331 = dma.done.wait (%p2934_p3), [#allocation12], 272   ;;  %p2935_p5 = pmov %p2934_p3 }
  0xad   : > { %p2936_p0 = pmov %p2934_p3 }
  0xae   : > { %2333 = vsyncadd (%p2935_p5), [#allocation12], 4294967024 }
  0xaf   : > { %2335 = dma.done.wait (%p2936_p0), [#allocation15], 272   ;;  %p2937_p4 = pmov %p2936_p0 }
  0xb0   : > { %p2938_p8 = pmov %p2936_p0 }
  0xb1   : > { %2337 = vsyncadd (%p2937_p4), [#allocation15], 4294967024 }
  0xb2   : > { %2339 = dma.done.wait (%p2938_p8), [#allocation18], 272   ;;  %p2939_p9 = pmov %p2936_p0 }
  0xb3   : > { %v2385_v0 = vmov 0.0   ;;  %vm2386_vm0 = vmmov 0   ;;  %v1976_v1 = vld [vmem:[#allocation14 + $0x8] sm:$0xff]   ;;  %v1977_v2 = vld [vmem:[#allocation14] sm:$0xff]   ;;  %vm640_vm1 = vcmask 261120   ;;  %v1978_v4 = vld [vmem:[#allocation11 + $0x8] sm:$0xff]  }
  0xb4   : > { %2341 = vsyncadd (%p2939_p9), [#allocation18], 4294967024  ;;  %1747 = vmatprep.subr.bf16.mxu0 %v2385_v0  ;;  %1751 = vmatprep.mubr.msk.bf16.mxu0 %vm2386_vm0, %v2385_v0  ;;  %v616_v3 = vld [vmem:[%s522_s28] sm:$0xf]  ;;  %v1979_v5 = vld [vmem:[#allocation11] sm:$0xff]   ;;  %vm685_vm2 = vcmask 257024  }
  0xb5   : > { %1755 = vmatprep.subr.bf16.mxu1 %v2385_v0  ;;  %1759 = vmatprep.mubr.msk.bf16.mxu1 %vm2386_vm0, %v2385_v0  ;;  %v756_v6 = vld [vmem:[%s513_s20] sm:$0xf]  ;;  %v687_v9 = vld [vmem:[%s531_s13] sm:$0xf]  ;;  %v1672_v10 = vld [vmem:[#allocation16] ss:$0 sm:$0xff] }
  0xb6   : > { %1748 = vmatpush3.bf16.msra.mxu0 %v1976_v1  ;;  %v1980_v7 = vld [vmem:[#allocation17 + $0x8] sm:$0xff]   ;;  %v1981_v8 = vld [vmem:[#allocation17] sm:$0xff]   ;;  %vm827_vm3 = vcmask 64512   ;;  %s2387_s27 = smov 112   ;;  %s2388_s17 = smov 120   ;;  %vm890_vm4 = vcmask 1043456  }
  0xb7   : > { %1749 = vmatprep.subr.bf16.mxu0 %v2385_v0  ;;  %1756 = vmatpush3.bf16.msra.mxu1 %v1980_v7  ;;  %v1680_v17 = vld [vmem:[#allocation13] ss:$0 sm:$0xff]  ;;  %s2389_s15 = smov 104   ;;  %v1676_v29 = vld [vmem:[#allocation19] ss:$0 sm:$0xff]  ;;  %s1671_s18 = sshll.u32 %s2654_s7, 5 }
  0xb8   : > { %1757 = vmatprep.subr.bf16.mxu1 %v2385_v0  ;;  %s2750_s11 = scalar_lea.vmem [#allocation21], %s1671_s18  ;;  %vm935_vm5 = vcmask 60416   ;;  %s2390_s19 = smov 8   ;;  %vm1065_vm6 = vcmask 126016   ;;  %vm1194_vm7 = vcmask 191616   ;;  %vm1323_vm8 = vcmask 257216  }
  0xb9   : > { %s2391_s3 = smov 16   ;;  %s2392_s16 = smov 24  }
  0xba   : > { %1750 = vmatpush3.bf16.msra.mxu0 %v1977_v2  ;;  %s1718_s12 = sshll.u32 %s2364_s24, 9  ;;  %s1427_s10 = sshll.u32 %s2750_s11, 4  ;;  %s2792_s10 = int_to_ptr.vmem [resolvable:$true] %s1427_s10 }
  0xbb   : > { %1763 = vmatprep.subr.bf16.mxu0 %v2385_v0  ;;  %1758 = vmatpush3.bf16.msra.mxu1 %v1981_v8  ;;  %s2940_s25 = sld [smem:[#allocation41_spill]]  ;;  %p2942_p12 = scmp.ne.s32.totalorder %s2923_s29, 0 }
  0xbc   : > { %1771 = vmatprep.subr.bf16.mxu1 %v2385_v0 }
  0xbd   : > { %1752 = vmatmul.mubr.msk.bf16.vlgmr.msra.gmra.mxu0 %vm640_vm1, %v616_v3 }
  0xbe   : > { %1764 = vmatpush3.bf16.msra.mxu0 %v1978_v4  ;;  %1767 = vmatprep.mubr.msk.bf16.mxu0 %vm2386_vm0, %v2385_v0 }
  0xbf   : > { %1765 = vmatprep.subr.bf16.mxu0 %v2385_v0  ;;  %1760 = vmatmul.mubr.msk.bf16.vlgmr.msra.gmra.mxu1 %vm640_vm1, %v687_v9 }
  0xc0   : > { %1773 = vmatprep.mubr.msk.bf16.mxu1 %vm2386_vm0, %v2385_v0 }
  0xc1   : > { %s2941_s28 = smov %s2940_s25  ;;  %s2790_s13 = scalar_lea.hbm %s2940_s25, %s1718_s12 }
  0xc2   : > { %1766 = vmatpush3.bf16.msra.mxu0 %v1979_v5 }
  0xc3   : > { %1777 = vmatprep.subr.bf16.mxu0 %v2385_v0 }
  0xc5   : > { %1768 = vmatmul.mubr.msk.bf16.vlgmr.msra.gmra.mxu0 %vm640_vm1, %v756_v6 }
  0xc6   : > { %1779 = vmatprep.mubr.msk.bf16.mxu0 %vm2386_vm0, %v2385_v0 }
 0x17d   : > { %v678_v11 = vpop.f32.mrf.mxu0 }
 0x17e   : > { %v679_v12 = vadd.f32 %v1672_v10, %v678_v11 }
 0x17f   : > { %v1753_v13 = vpop.f32.mrf.mxu0  ;;  %v748_v30 = vpop.f32.mrf.mxu1 }
 0x180   : > { %v684_v14 = vpack.c.bf16 %v679_v12, %v679_v12  ;;  %v749_v31 = vadd.f32 %v1676_v29, %v748_v30 }
 0x181   : > { %v681_v15 = vpop.f32.mrf.mxu0  ;;  %v1761_v32 = vpop.f32.mrf.mxu1 }
 0x182   : > { %686 = vst.msk [vmem:[#allocation2] sm:$0xf] %vm685_vm2, %v684_v14  ;;  %v754_v33 = vpack.c.bf16 %v749_v31, %v749_v31 }
 0x183   : > { %v1754_v16 = vpop.f32.mrf.mxu0  ;;  %v751_v34 = vpop.f32.mrf.mxu1 }
 0x184   : > { %755 = vst.msk [vmem:[#allocation3] sm:$0xf] %vm685_vm2, %v754_v33 }
 0x185   : > { %v818_v18 = vpop.f32.mrf.mxu0  ;;  %v1762_v35 = vpop.f32.mrf.mxu1 }
 0x186   : > { %v819_v19 = vadd.f32 %v1680_v17, %v818_v18 }
 0x187   : > { %v1769_v20 = vpop.f32.mrf.mxu0 }
 0x188   : > { %v824_v26 = vpack.c.bf16 %v819_v19, %v819_v19 }
 0x189   : > { %v825_v21 = vld [vmem:[#allocation2] sm:$0xf]  ;;  %v821_v23 = vpop.f32.mrf.mxu0 }
 0x18a   : > { %v1982_v22 = vld [vmem:[#allocation2] ss:$0 sps:$4 sm:$0xff]   ;;  %v832_v24 = vsel %vm827_vm3, %v825_v21, 0 }
 0x18b   : > { %v1983_v25 = vld [vmem:[#allocation2] ss:$0 sps:$4 sm:$0xff]   ;;  %1772 = vmatpush3.bf16.xpose.msra.mxu1 %v832_v24  ;;  %1074 = vrot.lane.b32.xlu1 %v1982_v22, %s2387_s27  ;;  %v1770_v27 = vpop.f32.mrf.mxu0  ;;  %v826_v36 = vld [vmem:[#allocation3] sm:$0xf] }
 0x18c   : > { %945 = vrot.lane.b32.xlu0 %v1983_v25, %s2388_s17  ;;  %1783 = vmatprep.subr.bf16.mxu1 %v2385_v0  ;;  %v1984_v28 = vld [vmem:[#allocation2] ss:$0 sps:$4 sm:$0xff]   ;;  %v892_v37 = vsel %vm890_vm4, %v826_v36, 0  ;;  %v1985_v9 = vld [vmem:[#allocation3] ss:$0 sps:$4 sm:$0xff]  }
 0x18d   : > { %1778 = vmatpush3.bf16.msra.mxu0 %v892_v37  ;;  %v1987_v30 = vld [vmem:[#allocation3] ss:$0 sps:$4 sm:$0xff]  }
 0x18e   : > { %1789 = vmatprep.subr.bf16.mxu0 %v2385_v0 }
 0x18f   : > { %1069 = vrot.lane.b32.xlu1 %v824_v26, %s2387_s27 }
 0x190   : > { %940 = vrot.lane.b32.xlu0 %v824_v26, %s2388_s17 }
 0x192   : > { %1774 = vmatmul.mubr.msk.bf16.vlgmr.msra.gmra.mxu1 %vm827_vm3, %v824_v26 }
 0x193   : > { %1198 = vrot.lane.b32.xlu1 %v824_v26, %s2389_s15  ;;  %1785 = vmatprep.mubr.msk.bf16.mxu1 %vm2386_vm0, %v2385_v0  ;;  %v1986_v26 = vld [vmem:[#allocation3] ss:$0 sps:$4 sm:$0xff]  }
 0x194   : > { %1203 = vrot.lane.b32.xlu0 %v1984_v28, %s2389_s15 }
 0x1fd   : > { %v1075_v40 = vpop.permute.xlu1 %1074 }
 0x1fe   : > { %v946_v38 = vpop.permute.xlu0 %945  ;;  %v1080_v42 = vsel %vm827_vm3, %v1075_v40, 0 }
 0x1ff   : > { %v951_v39 = vsel %vm827_vm3, %v946_v38, 0 }
 0x200   : > { %1784 = vmatpush3.bf16.xpose.msra.mxu1 %v951_v39 }
 0x201   : > { %1795 = vmatprep.subr.bf16.mxu1 %v2385_v0  ;;  %v1070_v44 = vpop.permute.xlu1 %1069 }
 0x202   : > { %v941_v41 = vpop.permute.xlu0 %940 }
 0x205   : > { %v1199_v46 = vpop.permute.xlu1 %1198 }
 0x206   : > { %v1204_v43 = vpop.permute.xlu0 %1203 }
 0x207   : > { %1786 = vmatmul.mubr.msk.bf16.vlgmr.msra.gmra.mxu1 %vm827_vm3, %v941_v41  ;;  %v1209_v45 = vsel %vm827_vm3, %v1204_v43, 0 }
 0x208   : > { %1796 = vmatpush3.bf16.xpose.msra.mxu1 %v1080_v42  ;;  %1797 = vmatprep.mubr.msk.bf16.mxu1 %vm2386_vm0, %v2385_v0 }
 0x209   : > { %1807 = vmatprep.subr.bf16.mxu1 %v2385_v0 }
 0x20f   : > { %1798 = vmatmul.mubr.msk.bf16.vlgmr.msra.gmra.mxu1 %vm827_vm3, %v1070_v44 }
 0x210   : > { %1808 = vmatpush3.bf16.xpose.msra.mxu1 %v1209_v45  ;;  %1809 = vmatprep.mubr.msk.bf16.mxu1 %vm2386_vm0, %v2385_v0 }
 0x211   : > { %1819 = vmatprep.subr.bf16.mxu1 %v2385_v0 }
 0x217   : > { %1810 = vmatmul.mubr.msk.bf16.vlgmr.msra.gmra.mxu1 %vm827_vm3, %v1199_v46 }
 0x218   : > { %1823 = vmatprep.mubr.msk.bf16.mxu1 %vm2386_vm0, %v2385_v0 }
 0x252   : > { %v868_v47 = vpop.f32.mrf.mxu1 }
 0x253   : > { %v874_v48 = vsel %vm827_vm3, %v868_v47, -inf }
 0x254   : > { %875 = vmax.xlane.f32.xlu0 %v874_v48  ;;  %v1775_v49 = vpop.f32.mrf.mxu1 }
 0x256   : > { %v871_v50 = vpop.f32.mrf.mxu1 }
 0x258   : > { %v1776_v51 = vpop.f32.mrf.mxu1 }
 0x2c7   : > { %v987_v52 = vpop.f32.mrf.mxu1 }
 0x2c8   : > { %v993_v53 = vsel %vm827_vm3, %v987_v52, -inf }
 0x2c9   : > { %994 = vmax.xlane.f32.xlu1 %v993_v53  ;;  %v1787_v54 = vpop.f32.mrf.mxu1 }
 0x2cb   : > { %v990_v55 = vpop.f32.mrf.mxu1 }
 0x2cd   : > { %v1788_v56 = vpop.f32.mrf.mxu1 }
 0x2cf   : > { %v1116_v57 = vpop.f32.mrf.mxu1 }
 0x2d0   : > { %v1122_v58 = vsel %vm827_vm3, %v1116_v57, -inf }
 0x2d1   : > { %1123 = vmax.xlane.f32.xlu0 %v1122_v58  ;;  %v1799_v59 = vpop.f32.mrf.mxu1 }
 0x2d2   : > { %v1988_v59 = vld [vmem:[%s2884_s9 + $0x8] sm:$0xff]  }
 0x2d3   : > { %v1119_v60 = vpop.f32.mrf.mxu1  ;;  %1820 = vmatpush3.bf16.msra.mxu1 %v1988_v59 }
 0x2d4   : > { %1821 = vmatprep.subr.bf16.mxu1 %v2385_v0 }
 0x2d5   : > { %v1800_v61 = vpop.f32.mrf.mxu1 }
 0x2d6   : > { %v1989_v61 = vld [vmem:[%s2884_s9] sm:$0xff]  }
 0x2d7   : > { %v1245_v62 = vpop.f32.mrf.mxu1  ;;  %1822 = vmatpush3.bf16.msra.mxu1 %v1989_v61 }
 0x2d8   : > { %v1251_v63 = vsel %vm827_vm3, %v1245_v62, -inf }
 0x2d9   : > { %1252 = vmax.xlane.f32.xlu0 %v1251_v63  ;;  %v1811_v1 = vpop.f32.mrf.mxu1 }
 0x2db   : > { %v1248_v2 = vpop.f32.mrf.mxu1 }
 0x2dd   : > { %v876_v3 = vpop.xlane.xlu0 %875  ;;  %v1812_v4 = vpop.f32.mrf.mxu1 }
 0x2de   : > { %v877_v5 = vsub.f32 %v868_v47, %v876_v3 }
 0x2e0   : > { %v878_v6 = vmul.f32 1.442695, %v877_v5 }
 0x2e2   : > { %1990 = vpow2.f32 %v878_v6 }
 0x2ef   : > { %v1991_v7 = vpop.eup %1990 }
 0x2f0   : > { %v880_v8 = vsel %vm827_vm3, %v1991_v7, 0.0 }
 0x2f1   : > { %881 = vadd.xlane.f32.xlu1 %v880_v8 }
 0x302   : > { %1010 = vrot.lane.b32.xlu1 %v1985_v9, %s2388_s17  ;;  %s2246_s17 = scalar_lea.vmem %s2792_s10, 512 }
 0x303   : > { %p2247_p1 = scmp.ne.s32.totalorder %s2792_s10, %s2246_s17 }
 0x305   : > { %p2248_p10 = pnand %p2247_p1, %p2942_p12 }
 0x307   : > { %p2249_p7 = pneg %p2248_p10 }
 0x352   : > { %v995_v10 = vpop.xlane.xlu1 %994 }
 0x353   : > { %v996_v11 = vsub.f32 %v987_v52, %v995_v10 }
 0x355   : > { %v997_v12 = vmul.f32 1.442695, %v996_v11 }
 0x357   : > { %1992 = vpow2.f32 %v997_v12 }
 0x35a   : > { %v1124_v13 = vpop.xlane.xlu0 %1123 }
 0x35b   : > { %v1125_v14 = vsub.f32 %v1116_v57, %v1124_v13 }
 0x35d   : > { %v1126_v15 = vmul.f32 1.442695, %v1125_v14 }
 0x35f   : > { %1994 = vpow2.f32 %v1126_v15 }
 0x362   : > { %v1253_v16 = vpop.xlane.xlu0 %1252 }
 0x363   : > { %v1254_v17 = vsub.f32 %v1245_v62, %v1253_v16 }
 0x364   : > { %v1993_v18 = vpop.eup %1992 }
 0x365   : > { %v1255_v19 = vmul.f32 1.442695, %v1254_v17  ;;  %v999_v20 = vsel %vm827_vm3, %v1993_v18, 0.0 }
 0x366   : > { %1000 = vadd.xlane.f32.xlu0 %v999_v20 }
 0x367   : > { %1996 = vpow2.f32 %v1255_v19 }
 0x36c   : > { %v1995_v21 = vpop.eup %1994 }
 0x36d   : > { %v1128_v22 = vsel %vm827_vm3, %v1995_v21, 0.0 }
 0x36e   : > { %1129 = vadd.xlane.f32.xlu1 %v1128_v22 }
 0x374   : > { %v1997_v23 = vpop.eup %1996 }
 0x375   : > { %v1257_v24 = vsel %vm827_vm3, %v1997_v23, 0.0 }
 0x376   : > { %1258 = vadd.xlane.f32.xlu0 %v1257_v24 }
 0x37a   : > { %v882_v25 = vpop.xlane.xlu1 %881 }
 0x37b   : > { %1998 = vrcp.f32 %v882_v25 }
 0x37e   : > { %v1011_v29 = vpop.permute.xlu1 %1010 }
 0x37f   : > { %1268 = vrot.lane.b32.xlu1 %v1986_v26, %s2389_s15  ;;  %v1016_v32 = vsel %vm890_vm4, %v1011_v29, 0  ;;  %s2393_s15 = smov [#allocation21]  }
 0x380   : > { %s2250_s18 = sshll.u32 %s2393_s15, 4  ;;  %s2251_s18 = int_to_ptr.vmem [resolvable:$false] %s2250_s18 }
 0x381   : > { %p2253_p13 = scmp.lt.s32.totalorder %s2792_s10, %s2251_s18 }
 0x388   : > { %v1999_v27 = vpop.eup %1998 }
 0x389   : > { %v884_v28 = vmul.f32 %v1999_v27, %v1991_v7 }
 0x38b   : > { %885 = vst.msk [vmem:[%s2750_s11] sm:$0xff] %vm827_vm3, %v884_v28  ;;  %v886_v31 = vpack.c.bf16 %v884_v28, %v884_v28 }
 0x38c   : > { %1139 = vrot.lane.b32.xlu0 %v1987_v30, %s2387_s27  ;;  %s1399_s27 = scalar_lea.sflag [#allocation22], %s2654_s7 }
 0x38d   : > { %1780 = vmatmul.mubr.msk.bf16.vlgmr.msra.gmra.mxu0 %vm827_vm3, %v886_v31 }
 0x38e   : > { %1790 = vmatpush3.bf16.msra.mxu0 %v1016_v32  ;;  %1791 = vmatprep.mubr.msk.bf16.mxu0 %vm2386_vm0, %v2385_v0 }
 0x38f   : > { %1801 = vmatprep.subr.bf16.mxu0 %v2385_v0 }
 0x3ef   : > { %v1001_v33 = vpop.xlane.xlu0 %1000 }
 0x3f0   : > { %2000 = vrcp.f32 %v1001_v33 }
 0x3f7   : > { %v1130_v34 = vpop.xlane.xlu1 %1129 }
 0x3f8   : > { %2002 = vrcp.f32 %v1130_v34 }
 0x3fb   : > { %v1269_v43 = vpop.permute.xlu1 %1268 }
 0x3fc   : > { %v1274_v45 = vsel %vm890_vm4, %v1269_v43, 0 }
 0x3fd   : > { %v2001_v35 = vpop.eup %2000 }
 0x3fe   : > { %v1003_v36 = vmul.f32 %v2001_v35, %v1993_v18 }
 0x3ff   : > { %v1259_v37 = vpop.xlane.xlu0 %1258 }
 0x400   : > { %2004 = vrcp.f32 %v1259_v37  ;;  %1688 = vst.msk [vmem:[%s2750_s11 + $0x8] sm:$0xff] %vm827_vm3, %v1003_v36  ;;  %v1006_v38 = vpack.c.bf16 %v1003_v36, %v1003_v36 }
 0x402   : > { %1792 = vmatmul.mubr.msk.bf16.vlgmr.msra.gmra.mxu0 %vm827_vm3, %v1006_v38 }
 0x403   : > { %v1140_v39 = vpop.permute.xlu0 %1139  ;;  %1803 = vmatprep.mubr.msk.bf16.mxu0 %vm2386_vm0, %v2385_v0 }
 0x404   : > { %v1145_v40 = vsel %vm890_vm4, %v1140_v39, 0 }
 0x405   : > { %v2003_v41 = vpop.eup %2002  ;;  %1802 = vmatpush3.bf16.msra.mxu0 %v1145_v40 }
 0x406   : > { %1813 = vmatprep.subr.bf16.mxu0 %v2385_v0  ;;  %v1132_v42 = vmul.f32 %v2003_v41, %v1995_v21 }
 0x408   : > { %1694 = vst.msk [vmem:[%s2750_s11 + $0x10] sm:$0xff] %vm827_vm3, %v1132_v42  ;;  %v1135_v44 = vpack.c.bf16 %v1132_v42, %v1132_v42 }
 0x40a   : > { %1804 = vmatmul.mubr.msk.bf16.vlgmr.msra.gmra.mxu0 %vm827_vm3, %v1135_v44 }
 0x40b   : > { %1814 = vmatpush3.bf16.msra.mxu0 %v1274_v45  ;;  %1815 = vmatprep.mubr.msk.bf16.mxu0 %vm2386_vm0, %v2385_v0 }
 0x40d   : > { %v2005_v46 = vpop.eup %2004 }
 0x40e   : > { %v1261_v47 = vmul.f32 %v2005_v46, %v1997_v23 }
 0x410   : > { %1700 = vst.msk [vmem:[%s2750_s11 + $0x18] sm:$0xff] %vm827_vm3, %v1261_v47  ;;  %v1264_v48 = vpack.c.bf16 %v1261_v47, %v1261_v47  ;;  %s2252_s11 = scalar_lea.vmem %s2251_s18, 1024 }
 0x411   : > { %p2254_p6 = scmp.lt.s32.totalorder %s2252_s11, %s2246_s17 }
 0x412   : > { %1816 = vmatmul.mubr.msk.bf16.vlgmr.msra.gmra.mxu0 %vm827_vm3, %v1264_v48 }
 0x413   : > { %p2255_p2 = por %p2254_p6, %p2253_p13 }
 0x415   : > { %p2256_p11 = pnand %p2255_p2, %p2249_p7 }
 0x44d   : > { %v928_v49 = vpop.f32.mrf.mxu0 }
 0x44e   : > { %v934_v50 = vpack.c.bf16 %v928_v49, %v928_v49 }
 0x44f   : > { %v1781_v51 = vpop.f32.mrf.mxu0 }
 0x450   : > { %936 = vst.msk [vmem:[#allocation4] sm:$0xf] %vm935_vm5, %v934_v50 }
 0x451   : > { %v931_v52 = vpop.f32.mrf.mxu0 }
 0x453   : > { %v1782_v53 = vpop.f32.mrf.mxu0 }
 0x4c2   : > { %v1052_v54 = vpop.f32.mrf.mxu0 }
 0x4c3   : > { %v1715_v55 = vpack.c.bf16 %v1052_v54, %v1052_v54 }
 0x4c4   : > { %v1793_v56 = vpop.f32.mrf.mxu0 }
 0x4c5   : > { %1062 = vrot.lane.b32.xlu1 %v1715_v55, %s2390_s19 }
 0x4c6   : > { %v1055_v57 = vpop.f32.mrf.mxu0 }
 0x4c8   : > { %v1794_v58 = vpop.f32.mrf.mxu0 }
 0x4ca   : > { %v1181_v60 = vpop.f32.mrf.mxu0 }
 0x4cb   : > { %v1716_v62 = vpack.c.bf16 %v1181_v60, %v1181_v60 }
 0x4cc   : > { %v1805_v63 = vpop.f32.mrf.mxu0 }
 0x4cd   : > { %1191 = vrot.lane.b32.xlu0 %v1716_v62, %s2391_s3 }
 0x4ce   : > { %v1184_v1 = vpop.f32.mrf.mxu0 }
 0x4d0   : > { %v1806_v2 = vpop.f32.mrf.mxu0 }
 0x4d2   : > { %v1310_v3 = vpop.f32.mrf.mxu0 }
 0x4d3   : > { %v1717_v4 = vpack.c.bf16 %v1310_v3, %v1310_v3 }
 0x4d4   : > { %v1817_v5 = vpop.f32.mrf.mxu0 }
 0x4d5   : > { %1320 = vrot.lane.b32.xlu1 %v1717_v4, %s2392_s16 }
 0x4d6   : > { %v1313_v6 = vpop.f32.mrf.mxu0 }
 0x4d8   : > { %v1818_v7 = vpop.f32.mrf.mxu0 }
 0x537   : > { %v1063_v8 = vpop.permute.xlu1 %1062 }
 0x538   : > { %1066 = vst.msk [vmem:[#allocation4] sm:$0xf] %vm1065_vm6, %v1063_v8 }
 0x53f   : > { %v1192_v0 = vpop.permute.xlu0 %1191 }
 0x540   : > { %1195 = vst.msk [vmem:[#allocation4] sm:$0xf] %vm1194_vm7, %v1192_v0 }
 0x547   : > { %v1321_v9 = vpop.permute.xlu1 %1320 }
 0x548   : > { %1324 = vst.msk [vmem:[#allocation4] sm:$0xf] %vm1323_vm8, %v1321_v9 }
 0x54f   : > { %v1325_v10 = vld [vmem:[#allocation4] sm:$0xf] }
 0x550   : > { %1824 = vmatmul.mubr.msk.bf16.vlgmr.msra.gmra.mxu1 %vm640_vm1, %v1325_v10 }
 0x551   : > { %2259 = shalt.err (!%p2256_p11)
}
 0x552   : > { %s2260_s14 = scalar_lea.hbm %s2790_s13, 512  ;;  %s2264_s26 = scalar_lea.hbm %s2941_s28, 1024 }
 0x553   : > { %p2261_p3 = scmp.ne.s32.totalorder %s2790_s13, %s2260_s14  ;;  %p2265_p4 = scmp.lt.s32.totalorder %s2790_s13, %s2941_s28 }
 0x554   : > { %p2266_p8 = scmp.lt.s32.totalorder %s2264_s26, %s2260_s14 }
 0x555   : > { %p2262_p5 = pnand %p2261_p3, %p2942_p12 }
 0x556   : > { %p2267_p9 = por %p2266_p8, %p2265_p4 }
 0x557   : > { %p2263_p0 = pneg %p2262_p5 }
 0x559   : > { %p2268_p1 = pnand %p2267_p9, %p2263_p0 }
 0x55b   : > { %2271 = shalt.err (!%p2268_p1)
}
 0x55c   : > { %s2394_s12 = smov 128   ;;  %s1670_s20 = sshll.u32 %s2654_s7, 3 }
 0x55d   : > { %1858 = dma.vmem_to_hbm [thread:$0]  (%p2942_p12), %s2792_s10, 512, %s2790_s13, %s1399_s27, %s2394_s12, %s2394_s12, %s2390_s19  }
 0x55e   : > { %s2943_s17 = sld [smem:[#allocation39_spill]]  ;;  %s1710_s15 = sshll.u32 %s2364_s24, 7 }
 0x55f   : > { %s603_s18 = scalar_lea.vmem [#allocation20], %s1670_s20  ;;  %s2944_s30 = sld [smem:[#allocation40_spill]] }
 0x560   : > { %s1413_s11 = sshll.u32 %s603_s18, 4  ;;  %s1394_s19 = scalar_lea.sflag [#allocation7], %s2654_s7  ;;  %s2828_s11 = int_to_ptr.vmem [resolvable:$true] %s1413_s11 }
 0x561   : > { %s2272_s24 = scalar_lea.vmem %s2828_s11, 128  ;;  %s2395_s10 = smov [#allocation20]  }
 0x562   : > { %p2273_p10 = scmp.ne.s32.totalorder %s2828_s11, %s2272_s24  ;;  %s2276_s13 = sshll.u32 %s2395_s10, 4  ;;  %s2277_s13 = int_to_ptr.vmem [resolvable:$false] %s2276_s13 }
 0x563   : > { %s2278_s27 = scalar_lea.vmem %s2277_s13, 256  ;;  %p2279_p6 = scmp.lt.s32.totalorder %s2828_s11, %s2277_s13 }
 0x564   : > { %v1704_v11 = vld [vmem:[%s2943_s17] ss:$0 sm:$0xff]  ;;  %p2274_p7 = pnand %p2273_p10, %p2942_p12  ;;  %p2280_p2 = scmp.lt.s32.totalorder %s2278_s27, %s2272_s24 }
 0x565   : > { %s2826_s26 = scalar_lea.hbm %s2944_s30, %s1710_s15 }
 0x566   : > { %p2275_p13 = pneg %p2274_p7  ;;  %p2281_p11 = por %p2280_p2, %p2279_p6 }
 0x568   : > { %p2282_p3 = pnand %p2281_p11, %p2275_p13 }
 0x610   : > { %v1386_v12 = vpop.f32.mrf.mxu1 }
 0x611   : > { %v1387_v13 = vadd.f32 %v1704_v11, %v1386_v12 }
 0x612   : > { %v1825_v14 = vpop.f32.mrf.mxu1 }
 0x613   : > { %1392 = vst.msk [vmem:[%s603_s18] sm:$0xff] %vm640_vm1, %v1387_v13 }
 0x614   : > { %v1389_v15 = vpop.f32.mrf.mxu1 }
 0x615   : > { %2285 = shalt.err (!%p2282_p3)
}
 0x616   : > { %s2286_s3 = scalar_lea.hbm %s2826_s26, 128  ;;  %s2290_s12 = scalar_lea.hbm %s2944_s30, 256 }
 0x617   : > { %p2287_p5 = scmp.ne.s32.totalorder %s2826_s26, %s2286_s3  ;;  %p2291_p8 = scmp.lt.s32.totalorder %s2826_s26, %s2944_s30 }
 0x618   : > { %p2292_p9 = scmp.lt.s32.totalorder %s2290_s12, %s2286_s3 }
 0x619   : > { %p2288_p0 = pnand %p2287_p5, %p2942_p12 }
 0x61a   : > { %p2293_p1 = por %p2292_p9, %p2291_p8 }
 0x61b   : > { %p2289_p4 = pneg %p2288_p0 }
 0x61d   : > { %p2294_p10 = pnand %p2293_p1, %p2289_p4 }
 0x61f   : > { %2297 = shalt.err (!%p2294_p10)
}
 0x620   : > { %1857 = dma.vmem_to_hbm [thread:$0]  (%p2942_p12), %s2828_s11, 128, %s2826_s26, %s1394_s19   ;;  %v1826_v16 = vpop.f32.mrf.mxu1 }
 0x621 PF: > { %s2945_s25 = sld [smem:[#allocation30_spill]] }
 0x622   : > { %s2946_s17 = sld [smem:[#allocation35_spill]] }
 0x623   : > { %s2947_s15 = sld [smem:[#allocation32_spill]] }
 0x627   : > { %s1442_s18 = sand.u32 1, %s2945_s25  }
 0x628   : > { %p2948_p7 = scmp.ne.s32.totalorder %s2946_s17, 0  ;;  %s1443_s14 = scalar_lea.sflag [#allocation7], %s1442_s18 }
 0x629   : > { %p2949_p13 = scmp.ge.s32.totalorder %s2947_s15, 2 }
 0x62b   : > { %p1891_p6 = pnand %p2949_p13, %p2948_p7 }
 0x62d   : > { %p1892_p2 = pneg %p1891_p6 }
 0x62f   : > { %2343 = dma.done.wait (%p1892_p2), %s1443_s14, 128  }
 0x630   : > { %2345 = vsyncadd (%p1892_p2), %s1443_s14, 4294967168  ;;  %s1452_s21 = scalar_lea.sflag [#allocation22], %s1442_s18 }
 0x631   : > { %2347 = dma.done.wait (%p1892_p2), %s1452_s21, 512  }
 0x632   : > { %2349 = vsyncadd (%p1892_p2), %s1452_s21, 4294966784  ;;  %s38_s26 = sadd.s32 1, %s2947_s15   ;;  %s2950_s29 = sld [smem:[#allocation34_spill]] }
 0x633   : > { %p35_p11 = scmp.ge.s32.totalorder %s38_s26, 4   ;;  %s2951_s24 = sld [smem:[#allocation31_spill]] }
 0x634   : > { %s2952_s25 = sld [smem:[#allocation33_spill]]  ;;  %s2953_s21 = smov %s2356_s22 }
 0x635   : > { %s2954_s22 = smov %s2360_s23  ;;  %37 = sbr.rel (!%p35_p11) target bundleno = 20 (0x14), region = 181 }
 0x638   : > { %s2955_s23 = smov %s2950_s29 }
 0x63a   :  { %1457 = vsyncpa [#allocation6], 1 }
 0x63b   :  { %1459 = vsyncpa [#allocation6 + $0x1], 1 }
 0x63c   :  { %1460 = vsyncpa [#allocation9], 1 }
 0x63d   :  { %1462 = vsyncpa [#allocation9 + $0x1], 1 }
 0x63e   :  { %1463 = vsyncpa [#allocation12], 1 }
 0x63f   :  { %1464 = vsyncpa [#allocation15], 1 }
 0x640   :  { %1465 = vsyncpa [#allocation18], 1 }
 0x641   :  { %1466 = vsyncpa [#allocation7], 1 }
 0x642   :  { %1468 = vsyncpa [#allocation7 + $0x1], 1 }
 0x643   :  { %1469 = vsyncpa [#allocation22], 1 }
 0x644   :  { %1471 = vsyncpa [#allocation22 + $0x1], 1 }

</bundles_post_ra>
